<compile_context>
chip_gen: v7x
topology: tpu7x:2x2x1
jax: 0.10.0
libtpu: 0.0.40
codegen_flags: <defaults>
</compile_context>

<pallas_src>
import numpy as np
import jax
import jax.numpy as jnp
from jax.experimental import pallas as pl
from jax.experimental.pallas import tpu as pltpu

BN_EPS = 1e-5


def _round_up(a, m):
    return ((a + m - 1) // m) * m


def init_params(key, signal_length, latent_dim=2):
    K1 = signal_length // 2
    ks = jax.random.split(key, 18)

    def w(k, shape, scale=0.1):
        return scale * jax.random.normal(k, shape, jnp.float32)

    return dict(
        conv1_w=w(ks[0], (16, 1, 5)),  conv1_b=w(ks[1], (16,)),
        bn1_g=1.0 + w(ks[2], (16,)),   bn1_b=w(ks[3], (16,)),
        conv2_w=w(ks[4], (16, 16, 5)), conv2_b=w(ks[5], (16,)),
        bn2_g=1.0 + w(ks[6], (16,)),   bn2_b=w(ks[7], (16,)),
        fc_mu_w=w(ks[8], (latent_dim, 16)),  fc_mu_b=w(ks[9], (latent_dim,)),
        fc_lv_w=w(ks[10], (latent_dim, 16)), fc_lv_b=w(ks[11], (latent_dim,)),
        dec_fc_w=w(ks[12], (16, latent_dim)), dec_fc_b=w(ks[13], (16,)),
        convt1_w=w(ks[14], (16, 16, K1)), convt1_b=w(ks[15], (16,)),
        convt2_w=w(ks[16], (16, 1, 1)),   convt2_b=w(ks[17], (1,)),
    )


def vae_forward(x, params, eps, latent_dim=2):
    """x: (B, 1, L) float32 (PyTorch NCL). Returns (x_recon (B,1,L), mu, logvar, z)."""
    B, _, L = x.shape
    K, S, P = 5, 3, 2
    C = 16
    L1 = (L + 2 * P - K) // S + 1          # conv1 output length
    Lp = L1 // 2                           # MaxPool1d(2) output (floor -> drops odd tail)
    L2 = (Lp + 2 * P - K) // S + 1         # conv2 output length
    K1 = L // 2                            # ConvTranspose1d kernel == stride
    reps = -(-L // K1)                     # repeats of the length-K1 decoder period
    Lxp8 = _round_up(L + 2 * P, 8)         # 8-aligned per-batch padded conv1 input stride
    Lpad8 = _round_up(Lp + 2 * P, 8)       # 8-aligned per-batch padded conv2 input stride
    assert L1 >= 2 and Lp >= 1 and L2 >= 1 and K1 >= 1

    # small-params-row lane offsets
    O_G1, O_B1, O_G2, O_B2 = 0, C, 2 * C, 3 * C
    O_HB = 4 * C
    O_CT2B = 4 * C + 2 * latent_dim
    SMALL_W = O_CT2B + 1

    # ---- wrapper glue: packed inputs (6 DMAs total) ----
    # per-batch zero-padded, 8-aligned input column (conv1 zero padding built in)
    xcol = jnp.pad(x[:, 0, :], ((0, 0), (P, Lxp8 - L - P))).reshape(B * Lxp8, 1)

    w1t = params["conv1_w"][:, 0, :].T                                    # (5, 16)  [k, co]
    w2s = jnp.transpose(params["conv2_w"], (2, 1, 0)).reshape(K * C, C)   # [k*16+ci, co]
    wenc = jnp.concatenate([w1t, w2s], axis=0)                            # (5+80, 16)

    wheads = jnp.concatenate([params["fc_mu_w"].T, params["fc_lv_w"].T], axis=1)  # (16, 2*lat)

    wt1f = params["convt1_w"].reshape(C, C * K1)                          # [ci, co*K1+j]
    bt1big = jnp.repeat(params["convt1_b"], K1)[None, :]                  # (1, 16*K1)
    w_dec = params["dec_fc_w"].T @ wt1f                                   # (lat, 16*K1)
    b_dec = params["dec_fc_b"][None, :] @ wt1f + bt1big                   # (1, 16*K1)
    wct2big = jnp.repeat(params["convt2_w"][:, 0, 0], K1)[None, :]        # (1, 16*K1)
    decpack = jnp.concatenate([w_dec, b_dec, wct2big], axis=0)            # (lat+2, 16*K1)

    small = jnp.concatenate(
        [params["bn1_g"], params["bn1_b"], params["bn2_g"], params["bn2_b"],
         params["fc_mu_b"], params["fc_lv_b"], params["convt2_b"]])[None, :]  # (1, SMALL_W)

    def kernel(xcol_ref, wenc_ref, small_ref, eps_ref, wheads_ref, dec_ref,
               xrec_ref, lat_ref, h1_ref, hp_ref):
        f32 = jnp.float32
        g1 = small_ref[:, O_G1:O_G1 + C]
        be1 = small_ref[:, O_B1:O_B1 + C]
        g2 = small_ref[:, O_G2:O_G2 + C]
        be2 = small_ref[:, O_B2:O_B2 + C]
        b_heads = small_ref[:, O_HB:O_HB + 2 * latent_dim]
        bct2 = small_ref[:, O_CT2B:O_CT2B + 1]

        # ---- Conv1d(1,16,5,s3,p2): stride-3 sublane tap loads from the padded
        #      column + VPU broadcast multiply-accumulate (conv bias cancels in BN). ----
        w1 = wenc_ref[0:K, :]                                             # (5, 16)
        a1 = None
        for k in range(K):
            col = jnp.concatenate(
                [xcol_ref[pl.ds(b * Lxp8 + k, L1, stride=3), :] for b in range(B)],
                axis=0)                                                   # (B*L1, 1)
            term = col * w1[k:k + 1, :]                                   # (B*L1, 16)
            a1 = term if a1 is None else a1 + term
        # BatchNorm1d (batch stats, train mode) + ReLU
        m1 = jnp.mean(a1, axis=0, keepdims=True)
        v1 = jnp.mean((a1 - m1) ** 2, axis=0, keepdims=True)
        h1 = (a1 - m1) * jax.lax.rsqrt(v1 + BN_EPS) * g1 + be1
        h1_ref[...] = jnp.maximum(h1, 0.0)

        # ---- MaxPool1d(2): stride-2 sublane loads; written into the 8-aligned
        #      zero-padded conv2 input buffer (pad rows stay 0 == conv zero pad) ----
        hp_ref[...] = jnp.zeros_like(hp_ref)
        for b in range(B):
            ev = h1_ref[pl.ds(b * L1, Lp, stride=2), :]
            od = h1_ref[pl.ds(b * L1 + 1, Lp, stride=2), :]
            hp_ref[b * Lpad8 + P: b * Lpad8 + P + Lp, :] = jnp.maximum(ev, od)

        # ---- Conv1d(16,16,5,s3,p2): stride-3 tap gather, lane-stacked into ONE
        #      (B*L2, 80) @ (80, 16) matmul (bias cancels in BN). ----
        rows = []
        for b in range(B):
            taps = [hp_ref[pl.ds(b * Lpad8 + k, L2, stride=3), :] for k in range(K)]
            rows.append(jnp.concatenate(taps, axis=1))                    # (L2, 5*16)
        patches = jnp.concatenate(rows, axis=0)                           # (B*L2, 80)
        a2 = jnp.dot(patches, wenc_ref[K:, :], preferred_element_type=f32)
        m2 = jnp.mean(a2, axis=0, keepdims=True)
        v2 = jnp.mean((a2 - m2) ** 2, axis=0, keepdims=True)
        h2 = jnp.maximum((a2 - m2) * jax.lax.rsqrt(v2 + BN_EPS) * g2 + be2, 0.0)

        # ---- AdaptiveAvgPool1d(1): per-batch mean over remaining length ----
        feat = jnp.concatenate(
            [jnp.mean(h2[b * L2:(b + 1) * L2, :], axis=0, keepdims=True)
             for b in range(B)], axis=0)                                  # (B, 16)

        # ---- fc_mu + fc_logvar (one matmul) + reparameterize ----
        heads = jnp.dot(feat, wheads_ref[...], preferred_element_type=f32) + b_heads
        mu = heads[:, :latent_dim]
        lv = heads[:, latent_dim:2 * latent_dim]
        z = mu + eps_ref[...] * jnp.exp(0.5 * lv)
        lat_ref[...] = jnp.concatenate([mu, lv, z], axis=1)               # packed (B, 3*d)

        # ---- decoder: dec_fc fused into ConvTranspose1d(16,16,K1,s=K1).
        #      Channel-constant repeated input => output periodic with period K1;
        #      compute one period per output channel in one matmul. ----
        y = jnp.dot(z, dec_ref[0:latent_dim, :], preferred_element_type=f32) \
            + dec_ref[latent_dim:latent_dim + 1, :]
        y = jnp.maximum(y, 0.0)                                           # (B, 16*K1)
        # ConvTranspose1d(16,1,1): per-channel scale + 4-step lane-segment tree sum.
        prod = y * dec_ref[latent_dim + 1:latent_dim + 2, :]
        width = C * K1
        while width > K1:
            half = width // 2
            prod = prod[:, :half] + prod[:, half:]
            width = half
        o_half = prod + bct2                                              # (B, K1)
        # repeat along length + crop to :L
        xrec_ref[...] = jnp.concatenate([o_half] * reps, axis=1)[:, :L]

    inputs = (xcol, wenc, small, eps, wheads, decpack)

    flops = 2 * (B * L1 * K * C            # conv1
                 + B * L2 * (K * C) * C    # conv2
                 + B * C * 2 * latent_dim  # fc_mu + fc_logvar
                 + B * latent_dim * C * K1)  # fused dec_fc @ convt1
    bytes_accessed = int(sum(int(np.prod(a.shape)) for a in inputs) * 4
                         + (B * L + B * 3 * latent_dim) * 4)
    cost = pl.CostEstimate(flops=int(flops),
                           transcendentals=int(B * latent_dim + 2 * C),
                           bytes_accessed=bytes_accessed)

    vmem = pl.BlockSpec(memory_space=pltpu.MemorySpace.VMEM)
    xrec, lat = pl.pallas_call(
        kernel,
        out_shape=(jax.ShapeDtypeStruct((B, L), jnp.float32),
                   jax.ShapeDtypeStruct((B, 3 * latent_dim), jnp.float32)),
        in_specs=[vmem] * len(inputs),
        out_specs=(vmem, vmem),
        scratch_shapes=[pltpu.VMEM((B * L1, C), jnp.float32),       # conv1 activations
                        pltpu.VMEM((B * Lpad8, C), jnp.float32)],   # 8-aligned padded maxpool out
        cost_estimate=cost,
    )(*inputs)

    mu = lat[:, :latent_dim]
    logvar = lat[:, latent_dim:2 * latent_dim]
    z = lat[:, 2 * latent_dim:]
    return xrec[:, None, :], mu, logvar, z


def vae_reference(x, params, eps, latent_dim=2):
    """Pure-JAX reference of the PyTorch forward (for correctness checking)."""
    B, _, L = x.shape
    K, S, P = 5, 3, 2
    L1 = (L + 2 * P - K) // S + 1
    Lp = L1 // 2
    L2 = (Lp + 2 * P - K) // S + 1
    K1 = L // 2
    xpad = jnp.pad(x[:, 0, :], ((0, 0), (P, P)))
    idx = S * np.arange(L1)[:, None] + np.arange(K)[None, :]
    cols = xpad[:, idx]                                              # (B, L1, K)
    a1 = jnp.einsum("blk,ck->blc", cols, params["conv1_w"][:, 0, :]) + params["conv1_b"]
    m1 = a1.mean(axis=(0, 1)); v1 = ((a1 - m1) ** 2).mean(axis=(0, 1))
    h1 = jnp.maximum((a1 - m1) / jnp.sqrt(v1 + BN_EPS) * params["bn1_g"] + params["bn1_b"], 0.0)
    hp = jnp.maximum(h1[:, 0:2 * Lp:2, :], h1[:, 1:2 * Lp:2, :])     # (B, Lp, 16)
    hppad = jnp.pad(hp, ((0, 0), (P, P), (0, 0)))
    idx2 = S * np.arange(L2)[:, None] + np.arange(K)[None, :]
    cols2 = hppad[:, idx2, :]                                        # (B, L2, K, 16)
    a2 = jnp.einsum("blkc,dck->bld", cols2, params["conv2_w"]) + params["conv2_b"]
    m2 = a2.mean(axis=(0, 1)); v2 = ((a2 - m2) ** 2).mean(axis=(0, 1))
    h2 = jnp.maximum((a2 - m2) / jnp.sqrt(v2 + BN_EPS) * params["bn2_g"] + params["bn2_b"], 0.0)
    feat = h2.mean(axis=1)                                           # (B, 16)
    mu = feat @ params["fc_mu_w"].T + params["fc_mu_b"]
    lv = feat @ params["fc_lv_w"].T + params["fc_lv_b"]
    z = mu + eps * jnp.exp(0.5 * lv)
    hd = z @ params["dec_fc_w"].T + params["dec_fc_b"]
    y = jnp.einsum("bi,iok->bok", hd, params["convt1_w"]) + params["convt1_b"][None, :, None]
    y = jnp.maximum(y, 0.0)                                          # one period (B,16,K1)
    o_half = jnp.einsum("bok,o->bk", y, params["convt2_w"][:, 0, 0]) + params["convt2_b"]
    reps = -(-L // K1)
    xr = jnp.tile(o_half, (1, reps))[:, :L]
    return xr[:, None, :], mu, lv, z


if __name__ == "__main__":
    B, L, latent_dim = 4, 32, 2
    key = jax.random.PRNGKey(0)
    kx, keps, kp = jax.random.split(key, 3)
    x = jax.random.normal(kx, (B, 1, L), jnp.float32)            # (B, 1, signal_length)
    eps = jax.random.normal(keps, (B, latent_dim), jnp.float32)  # reparameterization noise
    params = init_params(kp, L, latent_dim)

    xrec, mu, logvar, z = vae_forward(x, params, eps, latent_dim)
    jax.block_until_ready((xrec, mu, logvar, z))

    assert xrec.shape == (B, 1, L)
    assert mu.shape == (B, latent_dim) and logvar.shape == (B, latent_dim)
    assert z.shape == (B, latent_dim)
    assert bool(jnp.all(jnp.isfinite(xrec))) and bool(jnp.all(jnp.isfinite(z)))

    xr_r, mu_r, lv_r, z_r = vae_reference(x, params, eps, latent_dim)
    np.testing.assert_allclose(np.asarray(xrec), np.asarray(xr_r), rtol=1e-3, atol=1e-3)
    np.testing.assert_allclose(np.asarray(mu), np.asarray(mu_r), rtol=1e-3, atol=1e-3)
    np.testing.assert_allclose(np.asarray(logvar), np.asarray(lv_r), rtol=1e-3, atol=1e-3)
    np.testing.assert_allclose(np.asarray(z), np.asarray(z_r), rtol=1e-3, atol=1e-3)

    print("KERNEL_OK")
</pallas_src>

<mosaic_0001>
module attributes {stable_mosaic.version = 11 : i64} {
  func.func @kernel(%arg0: memref<160x1xf32, #tpu.memory_space<vmem>>, %arg1: memref<85x16xf32, #tpu.memory_space<vmem>>, %arg2: memref<1x69xf32, #tpu.memory_space<vmem>>, %arg3: memref<4x2xf32, #tpu.memory_space<vmem>>, %arg4: memref<16x4xf32, #tpu.memory_space<vmem>>, %arg5: memref<4x256xf32, #tpu.memory_space<vmem>>, %arg6: memref<4x32xf32, #tpu.memory_space<vmem>>, %arg7: memref<4x6xf32, #tpu.memory_space<vmem>>, %arg8: memref<44x16xf32, #tpu.memory_space<vmem>>, %arg9: memref<64x16xf32, #tpu.memory_space<vmem>>) attributes {dimension_semantics = [], scalar_prefetch = 0 : i64, scratch_operands = 2 : i64, tpu.core_type = #tpu.core_type<tc>} {
    %c0 = arith.constant 0 : index
    %c0_0 = arith.constant 0 : index
    %0 = vector.load %arg2[%c0, %c0_0] : memref<1x69xf32, #tpu.memory_space<vmem>>, vector<1x16xf32>
    %c0_1 = arith.constant 0 : index
    %c16 = arith.constant 16 : index
    %1 = vector.load %arg2[%c0_1, %c16] : memref<1x69xf32, #tpu.memory_space<vmem>>, vector<1x16xf32>
    %c0_2 = arith.constant 0 : index
    %c32 = arith.constant 32 : index
    %2 = vector.load %arg2[%c0_2, %c32] : memref<1x69xf32, #tpu.memory_space<vmem>>, vector<1x16xf32>
    %c0_3 = arith.constant 0 : index
    %c48 = arith.constant 48 : index
    %3 = vector.load %arg2[%c0_3, %c48] : memref<1x69xf32, #tpu.memory_space<vmem>>, vector<1x16xf32>
    %c0_4 = arith.constant 0 : index
    %c64 = arith.constant 64 : index
    %4 = vector.load %arg2[%c0_4, %c64] : memref<1x69xf32, #tpu.memory_space<vmem>>, vector<1x4xf32>
    %c0_5 = arith.constant 0 : index
    %c68 = arith.constant 68 : index
    %5 = vector.load %arg2[%c0_5, %c68] : memref<1x69xf32, #tpu.memory_space<vmem>>, vector<1x1xf32>
    %c0_6 = arith.constant 0 : index
    %c0_7 = arith.constant 0 : index
    %6 = vector.load %arg1[%c0_6, %c0_7] : memref<85x16xf32, #tpu.memory_space<vmem>>, vector<5x16xf32>
    %c0_8 = arith.constant 0 : index
    %c0_9 = arith.constant 0 : index
    %7 = tpu.strided_load %arg0[%c0_8, %c0_9] {strides = array<i32: 3, 1>} : memref<160x1xf32, #tpu.memory_space<vmem>>, vector<11x1xf32>
    %c40 = arith.constant 40 : index
    %c0_10 = arith.constant 0 : index
    %8 = tpu.strided_load %arg0[%c40, %c0_10] {strides = array<i32: 3, 1>} : memref<160x1xf32, #tpu.memory_space<vmem>>, vector<11x1xf32>
    %c80 = arith.constant 80 : index
    %c0_11 = arith.constant 0 : index
    %9 = tpu.strided_load %arg0[%c80, %c0_11] {strides = array<i32: 3, 1>} : memref<160x1xf32, #tpu.memory_space<vmem>>, vector<11x1xf32>
    %c120 = arith.constant 120 : index
    %c0_12 = arith.constant 0 : index
    %10 = tpu.strided_load %arg0[%c120, %c0_12] {strides = array<i32: 3, 1>} : memref<160x1xf32, #tpu.memory_space<vmem>>, vector<11x1xf32>
    %11 = tpu.concatenate %7, %8, %9, %10 in 0 : vector<11x1xf32>, vector<11x1xf32>, vector<11x1xf32>, vector<11x1xf32> -> vector<44x1xf32>
    %12 = vector.extract_strided_slice %6 {offsets = [0, 0], sizes = [1, 16], strides = [1, 1]} : vector<5x16xf32> to vector<1x16xf32>
    %13 = vector.broadcast %11 : vector<44x1xf32> to vector<44x16xf32>
    %14 = vector.broadcast %12 : vector<1x16xf32> to vector<44x16xf32>
    %15 = arith.mulf %13, %14 : vector<44x16xf32>
    %c1 = arith.constant 1 : index
    %c0_13 = arith.constant 0 : index
    %16 = tpu.strided_load %arg0[%c1, %c0_13] {strides = array<i32: 3, 1>} : memref<160x1xf32, #tpu.memory_space<vmem>>, vector<11x1xf32>
    %c41 = arith.constant 41 : index
    %c0_14 = arith.constant 0 : index
    %17 = tpu.strided_load %arg0[%c41, %c0_14] {strides = array<i32: 3, 1>} : memref<160x1xf32, #tpu.memory_space<vmem>>, vector<11x1xf32>
    %c81 = arith.constant 81 : index
    %c0_15 = arith.constant 0 : index
    %18 = tpu.strided_load %arg0[%c81, %c0_15] {strides = array<i32: 3, 1>} : memref<160x1xf32, #tpu.memory_space<vmem>>, vector<11x1xf32>
    %c121 = arith.constant 121 : index
    %c0_16 = arith.constant 0 : index
    %19 = tpu.strided_load %arg0[%c121, %c0_16] {strides = array<i32: 3, 1>} : memref<160x1xf32, #tpu.memory_space<vmem>>, vector<11x1xf32>
    %20 = tpu.concatenate %16, %17, %18, %19 in 0 : vector<11x1xf32>, vector<11x1xf32>, vector<11x1xf32>, vector<11x1xf32> -> vector<44x1xf32>
    %21 = vector.extract_strided_slice %6 {offsets = [1, 0], sizes = [1, 16], strides = [1, 1]} : vector<5x16xf32> to vector<1x16xf32>
    %22 = vector.broadcast %20 : vector<44x1xf32> to vector<44x16xf32>
    %23 = vector.broadcast %21 : vector<1x16xf32> to vector<44x16xf32>
    %24 = arith.mulf %22, %23 : vector<44x16xf32>
    %25 = arith.addf %15, %24 : vector<44x16xf32>
    %c2 = arith.constant 2 : index
    %c0_17 = arith.constant 0 : index
    %26 = tpu.strided_load %arg0[%c2, %c0_17] {strides = array<i32: 3, 1>} : memref<160x1xf32, #tpu.memory_space<vmem>>, vector<11x1xf32>
    %c42 = arith.constant 42 : index
    %c0_18 = arith.constant 0 : index
    %27 = tpu.strided_load %arg0[%c42, %c0_18] {strides = array<i32: 3, 1>} : memref<160x1xf32, #tpu.memory_space<vmem>>, vector<11x1xf32>
    %c82 = arith.constant 82 : index
    %c0_19 = arith.constant 0 : index
    %28 = tpu.strided_load %arg0[%c82, %c0_19] {strides = array<i32: 3, 1>} : memref<160x1xf32, #tpu.memory_space<vmem>>, vector<11x1xf32>
    %c122 = arith.constant 122 : index
    %c0_20 = arith.constant 0 : index
    %29 = tpu.strided_load %arg0[%c122, %c0_20] {strides = array<i32: 3, 1>} : memref<160x1xf32, #tpu.memory_space<vmem>>, vector<11x1xf32>
    %30 = tpu.concatenate %26, %27, %28, %29 in 0 : vector<11x1xf32>, vector<11x1xf32>, vector<11x1xf32>, vector<11x1xf32> -> vector<44x1xf32>
    %31 = vector.extract_strided_slice %6 {offsets = [2, 0], sizes = [1, 16], strides = [1, 1]} : vector<5x16xf32> to vector<1x16xf32>
    %32 = vector.broadcast %30 : vector<44x1xf32> to vector<44x16xf32>
    %33 = vector.broadcast %31 : vector<1x16xf32> to vector<44x16xf32>
    %34 = arith.mulf %32, %33 : vector<44x16xf32>
    %35 = arith.addf %25, %34 : vector<44x16xf32>
    %c3 = arith.constant 3 : index
    %c0_21 = arith.constant 0 : index
    %36 = tpu.strided_load %arg0[%c3, %c0_21] {strides = array<i32: 3, 1>} : memref<160x1xf32, #tpu.memory_space<vmem>>, vector<11x1xf32>
    %c43 = arith.constant 43 : index
    %c0_22 = arith.constant 0 : index
    %37 = tpu.strided_load %arg0[%c43, %c0_22] {strides = array<i32: 3, 1>} : memref<160x1xf32, #tpu.memory_space<vmem>>, vector<11x1xf32>
    %c83 = arith.constant 83 : index
    %c0_23 = arith.constant 0 : index
    %38 = tpu.strided_load %arg0[%c83, %c0_23] {strides = array<i32: 3, 1>} : memref<160x1xf32, #tpu.memory_space<vmem>>, vector<11x1xf32>
    %c123 = arith.constant 123 : index
    %c0_24 = arith.constant 0 : index
    %39 = tpu.strided_load %arg0[%c123, %c0_24] {strides = array<i32: 3, 1>} : memref<160x1xf32, #tpu.memory_space<vmem>>, vector<11x1xf32>
    %40 = tpu.concatenate %36, %37, %38, %39 in 0 : vector<11x1xf32>, vector<11x1xf32>, vector<11x1xf32>, vector<11x1xf32> -> vector<44x1xf32>
    %41 = vector.extract_strided_slice %6 {offsets = [3, 0], sizes = [1, 16], strides = [1, 1]} : vector<5x16xf32> to vector<1x16xf32>
    %42 = vector.broadcast %40 : vector<44x1xf32> to vector<44x16xf32>
    %43 = vector.broadcast %41 : vector<1x16xf32> to vector<44x16xf32>
    %44 = arith.mulf %42, %43 : vector<44x16xf32>
    %45 = arith.addf %35, %44 : vector<44x16xf32>
    %c4 = arith.constant 4 : index
    %c0_25 = arith.constant 0 : index
    %46 = tpu.strided_load %arg0[%c4, %c0_25] {strides = array<i32: 3, 1>} : memref<160x1xf32, #tpu.memory_space<vmem>>, vector<11x1xf32>
    %c44 = arith.constant 44 : index
    %c0_26 = arith.constant 0 : index
    %47 = tpu.strided_load %arg0[%c44, %c0_26] {strides = array<i32: 3, 1>} : memref<160x1xf32, #tpu.memory_space<vmem>>, vector<11x1xf32>
    %c84 = arith.constant 84 : index
    %c0_27 = arith.constant 0 : index
    %48 = tpu.strided_load %arg0[%c84, %c0_27] {strides = array<i32: 3, 1>} : memref<160x1xf32, #tpu.memory_space<vmem>>, vector<11x1xf32>
    %c124 = arith.constant 124 : index
    %c0_28 = arith.constant 0 : index
    %49 = tpu.strided_load %arg0[%c124, %c0_28] {strides = array<i32: 3, 1>} : memref<160x1xf32, #tpu.memory_space<vmem>>, vector<11x1xf32>
    %50 = tpu.concatenate %46, %47, %48, %49 in 0 : vector<11x1xf32>, vector<11x1xf32>, vector<11x1xf32>, vector<11x1xf32> -> vector<44x1xf32>
    %51 = vector.extract_strided_slice %6 {offsets = [4, 0], sizes = [1, 16], strides = [1, 1]} : vector<5x16xf32> to vector<1x16xf32>
    %52 = vector.broadcast %50 : vector<44x1xf32> to vector<44x16xf32>
    %53 = vector.broadcast %51 : vector<1x16xf32> to vector<44x16xf32>
    %54 = arith.mulf %52, %53 : vector<44x16xf32>
    %55 = arith.addf %45, %54 : vector<44x16xf32>
    %cst = arith.constant dense<0.000000e+00> : vector<16xf32>
    %56 = vector.multi_reduction <add>, %55, %cst [0] : vector<44x16xf32> to vector<16xf32>
    %57 = vector.shape_cast %56 : vector<16xf32> to vector<1x16xf32>
    %cst_29 = arith.constant 4.400000e+01 : f32
    %58 = vector.broadcast %cst_29 : f32 to vector<1x16xf32>
    %59 = arith.divf %57, %58 : vector<1x16xf32>
    %60 = vector.broadcast %59 : vector<1x16xf32> to vector<44x16xf32>
    %61 = arith.subf %55, %60 : vector<44x16xf32>
    %62 = arith.mulf %61, %61 : vector<44x16xf32>
    %cst_30 = arith.constant dense<0.000000e+00> : vector<16xf32>
    %63 = vector.multi_reduction <add>, %62, %cst_30 [0] : vector<44x16xf32> to vector<16xf32>
    %64 = vector.shape_cast %63 : vector<16xf32> to vector<1x16xf32>
    %cst_31 = arith.constant 4.400000e+01 : f32
    %65 = vector.broadcast %cst_31 : f32 to vector<1x16xf32>
    %66 = arith.divf %64, %65 : vector<1x16xf32>
    %67 = vector.broadcast %59 : vector<1x16xf32> to vector<44x16xf32>
    %68 = arith.subf %55, %67 : vector<44x16xf32>
    %cst_32 = arith.constant 9.99999974E-6 : f32
    %69 = vector.broadcast %cst_32 : f32 to vector<1x16xf32>
    %70 = arith.addf %66, %69 : vector<1x16xf32>
    %71 = math.rsqrt %70 : vector<1x16xf32>
    %72 = vector.broadcast %71 : vector<1x16xf32> to vector<44x16xf32>
    %73 = arith.mulf %68, %72 : vector<44x16xf32>
    %74 = vector.broadcast %0 : vector<1x16xf32> to vector<44x16xf32>
    %75 = arith.mulf %73, %74 : vector<44x16xf32>
    %76 = vector.broadcast %1 : vector<1x16xf32> to vector<44x16xf32>
    %77 = arith.addf %75, %76 : vector<44x16xf32>
    %cst_33 = arith.constant 0.000000e+00 : f32
    %78 = vector.broadcast %cst_33 : f32 to vector<44x16xf32>
    %79 = arith.maximumf %77, %78 : vector<44x16xf32>
    %c0_34 = arith.constant 0 : index
    %c0_35 = arith.constant 0 : index
    %80 = vector.load %arg8[%c0_34, %c0_35] : memref<44x16xf32, #tpu.memory_space<vmem>>, vector<44x16xf32>
    tpu.vector_store %arg8[%c0_34, %c0_35], %79 {strides = array<i32>} : memref<44x16xf32, #tpu.memory_space<vmem>>, vector<44x16xf32>,
    %cst_36 = arith.constant 0.000000e+00 : f32
    %81 = vector.broadcast %cst_36 : f32 to vector<64x16xf32>
    %c0_37 = arith.constant 0 : index
    %c0_38 = arith.constant 0 : index
    %82 = vector.load %arg9[%c0_37, %c0_38] : memref<64x16xf32, #tpu.memory_space<vmem>>, vector<64x16xf32>
    tpu.vector_store %arg9[%c0_37, %c0_38], %81 {strides = array<i32>} : memref<64x16xf32, #tpu.memory_space<vmem>>, vector<64x16xf32>,
    %c0_39 = arith.constant 0 : index
    %c0_40 = arith.constant 0 : index
    %83 = tpu.strided_load %arg8[%c0_39, %c0_40] {strides = array<i32: 2, 1>} : memref<44x16xf32, #tpu.memory_space<vmem>>, vector<5x16xf32>
    %c1_41 = arith.constant 1 : index
    %c0_42 = arith.constant 0 : index
    %84 = tpu.strided_load %arg8[%c1_41, %c0_42] {strides = array<i32: 2, 1>} : memref<44x16xf32, #tpu.memory_space<vmem>>, vector<5x16xf32>
    %85 = arith.maximumf %83, %84 : vector<5x16xf32>
    %c2_43 = arith.constant 2 : index
    %c0_44 = arith.constant 0 : index
    %86 = vector.load %arg9[%c2_43, %c0_44] : memref<64x16xf32, #tpu.memory_space<vmem>>, vector<5x16xf32>
    tpu.vector_store %arg9[%c2_43, %c0_44], %85 {strides = array<i32>} : memref<64x16xf32, #tpu.memory_space<vmem>>, vector<5x16xf32>,
    %c11 = arith.constant 11 : index
    %c0_45 = arith.constant 0 : index
    %87 = tpu.strided_load %arg8[%c11, %c0_45] {strides = array<i32: 2, 1>} : memref<44x16xf32, #tpu.memory_space<vmem>>, vector<5x16xf32>
    %c12 = arith.constant 12 : index
    %c0_46 = arith.constant 0 : index
    %88 = tpu.strided_load %arg8[%c12, %c0_46] {strides = array<i32: 2, 1>} : memref<44x16xf32, #tpu.memory_space<vmem>>, vector<5x16xf32>
    %89 = arith.maximumf %87, %88 : vector<5x16xf32>
    %c18 = arith.constant 18 : index
    %c0_47 = arith.constant 0 : index
    %90 = vector.load %arg9[%c18, %c0_47] : memref<64x16xf32, #tpu.memory_space<vmem>>, vector<5x16xf32>
    tpu.vector_store %arg9[%c18, %c0_47], %89 {strides = array<i32>} : memref<64x16xf32, #tpu.memory_space<vmem>>, vector<5x16xf32>,
    %c22 = arith.constant 22 : index
    %c0_48 = arith.constant 0 : index
    %91 = tpu.strided_load %arg8[%c22, %c0_48] {strides = array<i32: 2, 1>} : memref<44x16xf32, #tpu.memory_space<vmem>>, vector<5x16xf32>
    %c23 = arith.constant 23 : index
    %c0_49 = arith.constant 0 : index
    %92 = tpu.strided_load %arg8[%c23, %c0_49] {strides = array<i32: 2, 1>} : memref<44x16xf32, #tpu.memory_space<vmem>>, vector<5x16xf32>
    %93 = arith.maximumf %91, %92 : vector<5x16xf32>
    %c34 = arith.constant 34 : index
    %c0_50 = arith.constant 0 : index
    %94 = vector.load %arg9[%c34, %c0_50] : memref<64x16xf32, #tpu.memory_space<vmem>>, vector<5x16xf32>
    tpu.vector_store %arg9[%c34, %c0_50], %93 {strides = array<i32>} : memref<64x16xf32, #tpu.memory_space<vmem>>, vector<5x16xf32>,
    %c33 = arith.constant 33 : index
    %c0_51 = arith.constant 0 : index
    %95 = tpu.strided_load %arg8[%c33, %c0_51] {strides = array<i32: 2, 1>} : memref<44x16xf32, #tpu.memory_space<vmem>>, vector<5x16xf32>
    %c34_52 = arith.constant 34 : index
    %c0_53 = arith.constant 0 : index
    %96 = tpu.strided_load %arg8[%c34_52, %c0_53] {strides = array<i32: 2, 1>} : memref<44x16xf32, #tpu.memory_space<vmem>>, vector<5x16xf32>
    %97 = arith.maximumf %95, %96 : vector<5x16xf32>
    %c50 = arith.constant 50 : index
    %c0_54 = arith.constant 0 : index
    %98 = vector.load %arg9[%c50, %c0_54] : memref<64x16xf32, #tpu.memory_space<vmem>>, vector<5x16xf32>
    tpu.vector_store %arg9[%c50, %c0_54], %97 {strides = array<i32>} : memref<64x16xf32, #tpu.memory_space<vmem>>, vector<5x16xf32>,
    %c0_55 = arith.constant 0 : index
    %c0_56 = arith.constant 0 : index
    %99 = tpu.strided_load %arg9[%c0_55, %c0_56] {strides = array<i32: 3, 1>} : memref<64x16xf32, #tpu.memory_space<vmem>>, vector<2x16xf32>
    %c1_57 = arith.constant 1 : index
    %c0_58 = arith.constant 0 : index
    %100 = tpu.strided_load %arg9[%c1_57, %c0_58] {strides = array<i32: 3, 1>} : memref<64x16xf32, #tpu.memory_space<vmem>>, vector<2x16xf32>
    %c2_59 = arith.constant 2 : index
    %c0_60 = arith.constant 0 : index
    %101 = tpu.strided_load %arg9[%c2_59, %c0_60] {strides = array<i32: 3, 1>} : memref<64x16xf32, #tpu.memory_space<vmem>>, vector<2x16xf32>
    %c3_61 = arith.constant 3 : index
    %c0_62 = arith.constant 0 : index
    %102 = tpu.strided_load %arg9[%c3_61, %c0_62] {strides = array<i32: 3, 1>} : memref<64x16xf32, #tpu.memory_space<vmem>>, vector<2x16xf32>
    %c4_63 = arith.constant 4 : index
    %c0_64 = arith.constant 0 : index
    %103 = tpu.strided_load %arg9[%c4_63, %c0_64] {strides = array<i32: 3, 1>} : memref<64x16xf32, #tpu.memory_space<vmem>>, vector<2x16xf32>
    %104 = tpu.concatenate %99, %100, %101, %102, %103 in 1 : vector<2x16xf32>, vector<2x16xf32>, vector<2x16xf32>, vector<2x16xf32>, vector<2x16xf32> -> vector<2x80xf32>
    %c16_65 = arith.constant 16 : index
    %c0_66 = arith.constant 0 : index
    %105 = tpu.strided_load %arg9[%c16_65, %c0_66] {strides = array<i32: 3, 1>} : memref<64x16xf32, #tpu.memory_space<vmem>>, vector<2x16xf32>
    %c17 = arith.constant 17 : index
    %c0_67 = arith.constant 0 : index
    %106 = tpu.strided_load %arg9[%c17, %c0_67] {strides = array<i32: 3, 1>} : memref<64x16xf32, #tpu.memory_space<vmem>>, vector<2x16xf32>
    %c18_68 = arith.constant 18 : index
    %c0_69 = arith.constant 0 : index
    %107 = tpu.strided_load %arg9[%c18_68, %c0_69] {strides = array<i32: 3, 1>} : memref<64x16xf32, #tpu.memory_space<vmem>>, vector<2x16xf32>
    %c19 = arith.constant 19 : index
    %c0_70 = arith.constant 0 : index
    %108 = tpu.strided_load %arg9[%c19, %c0_70] {strides = array<i32: 3, 1>} : memref<64x16xf32, #tpu.memory_space<vmem>>, vector<2x16xf32>
    %c20 = arith.constant 20 : index
    %c0_71 = arith.constant 0 : index
    %109 = tpu.strided_load %arg9[%c20, %c0_71] {strides = array<i32: 3, 1>} : memref<64x16xf32, #tpu.memory_space<vmem>>, vector<2x16xf32>
    %110 = tpu.concatenate %105, %106, %107, %108, %109 in 1 : vector<2x16xf32>, vector<2x16xf32>, vector<2x16xf32>, vector<2x16xf32>, vector<2x16xf32> -> vector<2x80xf32>
    %c32_72 = arith.constant 32 : index
    %c0_73 = arith.constant 0 : index
    %111 = tpu.strided_load %arg9[%c32_72, %c0_73] {strides = array<i32: 3, 1>} : memref<64x16xf32, #tpu.memory_space<vmem>>, vector<2x16xf32>
    %c33_74 = arith.constant 33 : index
    %c0_75 = arith.constant 0 : index
    %112 = tpu.strided_load %arg9[%c33_74, %c0_75] {strides = array<i32: 3, 1>} : memref<64x16xf32, #tpu.memory_space<vmem>>, vector<2x16xf32>
    %c34_76 = arith.constant 34 : index
    %c0_77 = arith.constant 0 : index
    %113 = tpu.strided_load %arg9[%c34_76, %c0_77] {strides = array<i32: 3, 1>} : memref<64x16xf32, #tpu.memory_space<vmem>>, vector<2x16xf32>
    %c35 = arith.constant 35 : index
    %c0_78 = arith.constant 0 : index
    %114 = tpu.strided_load %arg9[%c35, %c0_78] {strides = array<i32: 3, 1>} : memref<64x16xf32, #tpu.memory_space<vmem>>, vector<2x16xf32>
    %c36 = arith.constant 36 : index
    %c0_79 = arith.constant 0 : index
    %115 = tpu.strided_load %arg9[%c36, %c0_79] {strides = array<i32: 3, 1>} : memref<64x16xf32, #tpu.memory_space<vmem>>, vector<2x16xf32>
    %116 = tpu.concatenate %111, %112, %113, %114, %115 in 1 : vector<2x16xf32>, vector<2x16xf32>, vector<2x16xf32>, vector<2x16xf32>, vector<2x16xf32> -> vector<2x80xf32>
    %c48_80 = arith.constant 48 : index
    %c0_81 = arith.constant 0 : index
    %117 = tpu.strided_load %arg9[%c48_80, %c0_81] {strides = array<i32: 3, 1>} : memref<64x16xf32, #tpu.memory_space<vmem>>, vector<2x16xf32>
    %c49 = arith.constant 49 : index
    %c0_82 = arith.constant 0 : index
    %118 = tpu.strided_load %arg9[%c49, %c0_82] {strides = array<i32: 3, 1>} : memref<64x16xf32, #tpu.memory_space<vmem>>, vector<2x16xf32>
    %c50_83 = arith.constant 50 : index
    %c0_84 = arith.constant 0 : index
    %119 = tpu.strided_load %arg9[%c50_83, %c0_84] {strides = array<i32: 3, 1>} : memref<64x16xf32, #tpu.memory_space<vmem>>, vector<2x16xf32>
    %c51 = arith.constant 51 : index
    %c0_85 = arith.constant 0 : index
    %120 = tpu.strided_load %arg9[%c51, %c0_85] {strides = array<i32: 3, 1>} : memref<64x16xf32, #tpu.memory_space<vmem>>, vector<2x16xf32>
    %c52 = arith.constant 52 : index
    %c0_86 = arith.constant 0 : index
    %121 = tpu.strided_load %arg9[%c52, %c0_86] {strides = array<i32: 3, 1>} : memref<64x16xf32, #tpu.memory_space<vmem>>, vector<2x16xf32>
    %122 = tpu.concatenate %117, %118, %119, %120, %121 in 1 : vector<2x16xf32>, vector<2x16xf32>, vector<2x16xf32>, vector<2x16xf32>, vector<2x16xf32> -> vector<2x80xf32>
    %123 = tpu.concatenate %104, %110, %116, %122 in 0 : vector<2x80xf32>, vector<2x80xf32>, vector<2x80xf32>, vector<2x80xf32> -> vector<8x80xf32>
    %c5 = arith.constant 5 : index
    %c0_87 = arith.constant 0 : index
    %124 = vector.load %arg1[%c5, %c0_87] : memref<85x16xf32, #tpu.memory_space<vmem>>, vector<80x16xf32>
    %cst_88 = arith.constant dense<0.000000e+00> : vector<8x16xf32>
    %125 = tpu.matmul %123, %124, %cst_88 {dimension_numbers = #tpu.dot_dimension_numbers<[1], [0], [0], [1], [0, 0, 1, 1], [], []>} : vector<8x80xf32>, vector<80x16xf32>, vector<8x16xf32> -> vector<8x16xf32>
    %cst_89 = arith.constant dense<0.000000e+00> : vector<16xf32>
    %126 = vector.multi_reduction <add>, %125, %cst_89 [0] : vector<8x16xf32> to vector<16xf32>
    %127 = vector.shape_cast %126 : vector<16xf32> to vector<1x16xf32>
    %cst_90 = arith.constant 8.000000e+00 : f32
    %128 = vector.broadcast %cst_90 : f32 to vector<1x16xf32>
    %129 = arith.divf %127, %128 : vector<1x16xf32>
    %130 = vector.broadcast %129 : vector<1x16xf32> to vector<8x16xf32>
    %131 = arith.subf %125, %130 : vector<8x16xf32>
    %132 = arith.mulf %131, %131 : vector<8x16xf32>
    %cst_91 = arith.constant dense<0.000000e+00> : vector<16xf32>
    %133 = vector.multi_reduction <add>, %132, %cst_91 [0] : vector<8x16xf32> to vector<16xf32>
    %134 = vector.shape_cast %133 : vector<16xf32> to vector<1x16xf32>
    %cst_92 = arith.constant 8.000000e+00 : f32
    %135 = vector.broadcast %cst_92 : f32 to vector<1x16xf32>
    %136 = arith.divf %134, %135 : vector<1x16xf32>
    %137 = vector.broadcast %129 : vector<1x16xf32> to vector<8x16xf32>
    %138 = arith.subf %125, %137 : vector<8x16xf32>
    %cst_93 = arith.constant 9.99999974E-6 : f32
    %139 = vector.broadcast %cst_93 : f32 to vector<1x16xf32>
    %140 = arith.addf %136, %139 : vector<1x16xf32>
    %141 = math.rsqrt %140 : vector<1x16xf32>
    %142 = vector.broadcast %141 : vector<1x16xf32> to vector<8x16xf32>
    %143 = arith.mulf %138, %142 : vector<8x16xf32>
    %144 = vector.broadcast %2 : vector<1x16xf32> to vector<8x16xf32>
    %145 = arith.mulf %143, %144 : vector<8x16xf32>
    %146 = vector.broadcast %3 : vector<1x16xf32> to vector<8x16xf32>
    %147 = arith.addf %145, %146 : vector<8x16xf32>
    %cst_94 = arith.constant 0.000000e+00 : f32
    %148 = vector.broadcast %cst_94 : f32 to vector<8x16xf32>
    %149 = arith.maximumf %147, %148 : vector<8x16xf32>
    %150 = vector.extract_strided_slice %149 {offsets = [0, 0], sizes = [2, 16], strides = [1, 1]} : vector<8x16xf32> to vector<2x16xf32>
    %cst_95 = arith.constant dense<0.000000e+00> : vector<16xf32>
    %151 = vector.multi_reduction <add>, %150, %cst_95 [0] : vector<2x16xf32> to vector<16xf32>
    %152 = vector.shape_cast %151 : vector<16xf32> to vector<1x16xf32>
    %cst_96 = arith.constant 2.000000e+00 : f32
    %153 = vector.broadcast %cst_96 : f32 to vector<1x16xf32>
    %154 = arith.divf %152, %153 : vector<1x16xf32>
    %155 = vector.extract_strided_slice %149 {offsets = [2, 0], sizes = [2, 16], strides = [1, 1]} : vector<8x16xf32> to vector<2x16xf32>
    %cst_97 = arith.constant dense<0.000000e+00> : vector<16xf32>
    %156 = vector.multi_reduction <add>, %155, %cst_97 [0] : vector<2x16xf32> to vector<16xf32>
    %157 = vector.shape_cast %156 : vector<16xf32> to vector<1x16xf32>
    %cst_98 = arith.constant 2.000000e+00 : f32
    %158 = vector.broadcast %cst_98 : f32 to vector<1x16xf32>
    %159 = arith.divf %157, %158 : vector<1x16xf32>
    %160 = vector.extract_strided_slice %149 {offsets = [4, 0], sizes = [2, 16], strides = [1, 1]} : vector<8x16xf32> to vector<2x16xf32>
    %cst_99 = arith.constant dense<0.000000e+00> : vector<16xf32>
    %161 = vector.multi_reduction <add>, %160, %cst_99 [0] : vector<2x16xf32> to vector<16xf32>
    %162 = vector.shape_cast %161 : vector<16xf32> to vector<1x16xf32>
    %cst_100 = arith.constant 2.000000e+00 : f32
    %163 = vector.broadcast %cst_100 : f32 to vector<1x16xf32>
    %164 = arith.divf %162, %163 : vector<1x16xf32>
    %165 = vector.extract_strided_slice %149 {offsets = [6, 0], sizes = [2, 16], strides = [1, 1]} : vector<8x16xf32> to vector<2x16xf32>
    %cst_101 = arith.constant dense<0.000000e+00> : vector<16xf32>
    %166 = vector.multi_reduction <add>, %165, %cst_101 [0] : vector<2x16xf32> to vector<16xf32>
    %167 = vector.shape_cast %166 : vector<16xf32> to vector<1x16xf32>
    %cst_102 = arith.constant 2.000000e+00 : f32
    %168 = vector.broadcast %cst_102 : f32 to vector<1x16xf32>
    %169 = arith.divf %167, %168 : vector<1x16xf32>
    %170 = tpu.concatenate %154, %159, %164, %169 in 0 : vector<1x16xf32>, vector<1x16xf32>, vector<1x16xf32>, vector<1x16xf32> -> vector<4x16xf32>
    %c0_103 = arith.constant 0 : index
    %c0_104 = arith.constant 0 : index
    %171 = vector.load %arg4[%c0_103, %c0_104] : memref<16x4xf32, #tpu.memory_space<vmem>>, vector<16x4xf32>
    %cst_105 = arith.constant dense<0.000000e+00> : vector<4x4xf32>
    %172 = tpu.matmul %170, %171, %cst_105 {dimension_numbers = #tpu.dot_dimension_numbers<[1], [0], [0], [1], [0, 0, 1, 1], [], []>} : vector<4x16xf32>, vector<16x4xf32>, vector<4x4xf32> -> vector<4x4xf32>
    %173 = vector.broadcast %4 : vector<1x4xf32> to vector<4x4xf32>
    %174 = arith.addf %172, %173 : vector<4x4xf32>
    %175 = vector.extract_strided_slice %174 {offsets = [0, 0], sizes = [4, 2], strides = [1, 1]} : vector<4x4xf32> to vector<4x2xf32>
    %176 = vector.extract_strided_slice %174 {offsets = [0, 2], sizes = [4, 2], strides = [1, 1]} : vector<4x4xf32> to vector<4x2xf32>
    %c0_106 = arith.constant 0 : index
    %c0_107 = arith.constant 0 : index
    %177 = vector.load %arg3[%c0_106, %c0_107] : memref<4x2xf32, #tpu.memory_space<vmem>>, vector<4x2xf32>
    %cst_108 = arith.constant 5.000000e-01 : f32
    %178 = vector.broadcast %cst_108 : f32 to vector<4x2xf32>
    %179 = arith.mulf %178, %176 : vector<4x2xf32>
    %180 = math.exp %179 : vector<4x2xf32>
    %181 = arith.mulf %177, %180 : vector<4x2xf32>
    %182 = arith.addf %175, %181 : vector<4x2xf32>
    %183 = tpu.concatenate %175, %176, %182 in 1 : vector<4x2xf32>, vector<4x2xf32>, vector<4x2xf32> -> vector<4x6xf32>
    %c0_109 = arith.constant 0 : index
    %c0_110 = arith.constant 0 : index
    %184 = vector.load %arg7[%c0_109, %c0_110] : memref<4x6xf32, #tpu.memory_space<vmem>>, vector<4x6xf32>
    tpu.vector_store %arg7[%c0_109, %c0_110], %183 {strides = array<i32>} : memref<4x6xf32, #tpu.memory_space<vmem>>, vector<4x6xf32>,
    %c0_111 = arith.constant 0 : index
    %c0_112 = arith.constant 0 : index
    %185 = vector.load %arg5[%c0_111, %c0_112] : memref<4x256xf32, #tpu.memory_space<vmem>>, vector<2x256xf32>
    %cst_113 = arith.constant dense<0.000000e+00> : vector<4x256xf32>
    %186 = tpu.matmul %182, %185, %cst_113 {dimension_numbers = #tpu.dot_dimension_numbers<[1], [0], [0], [1], [0, 0, 1, 1], [], []>} : vector<4x2xf32>, vector<2x256xf32>, vector<4x256xf32> -> vector<4x256xf32>
    %c2_114 = arith.constant 2 : index
    %c0_115 = arith.constant 0 : index
    %187 = vector.load %arg5[%c2_114, %c0_115] : memref<4x256xf32, #tpu.memory_space<vmem>>, vector<1x256xf32>
    %188 = vector.broadcast %187 : vector<1x256xf32> to vector<4x256xf32>
    %189 = arith.addf %186, %188 : vector<4x256xf32>
    %cst_116 = arith.constant 0.000000e+00 : f32
    %190 = vector.broadcast %cst_116 : f32 to vector<4x256xf32>
    %191 = arith.maximumf %189, %190 : vector<4x256xf32>
    %c3_117 = arith.constant 3 : index
    %c0_118 = arith.constant 0 : index
    %192 = vector.load %arg5[%c3_117, %c0_118] : memref<4x256xf32, #tpu.memory_space<vmem>>, vector<1x256xf32>
    %193 = vector.broadcast %192 : vector<1x256xf32> to vector<4x256xf32>
    %194 = arith.mulf %191, %193 : vector<4x256xf32>
    %195 = vector.extract_strided_slice %194 {offsets = [0, 0], sizes = [4, 128], strides = [1, 1]} : vector<4x256xf32> to vector<4x128xf32>
    %196 = vector.extract_strided_slice %194 {offsets = [0, 128], sizes = [4, 128], strides = [1, 1]} : vector<4x256xf32> to vector<4x128xf32>
    %197 = arith.addf %195, %196 : vector<4x128xf32>
    %198 = vector.extract_strided_slice %197 {offsets = [0, 0], sizes = [4, 64], strides = [1, 1]} : vector<4x128xf32> to vector<4x64xf32>
    %199 = vector.extract_strided_slice %197 {offsets = [0, 64], sizes = [4, 64], strides = [1, 1]} : vector<4x128xf32> to vector<4x64xf32>
    %200 = arith.addf %198, %199 : vector<4x64xf32>
    %201 = vector.extract_strided_slice %200 {offsets = [0, 0], sizes = [4, 32], strides = [1, 1]} : vector<4x64xf32> to vector<4x32xf32>
    %202 = vector.extract_strided_slice %200 {offsets = [0, 32], sizes = [4, 32], strides = [1, 1]} : vector<4x64xf32> to vector<4x32xf32>
    %203 = arith.addf %201, %202 : vector<4x32xf32>
    %204 = vector.extract_strided_slice %203 {offsets = [0, 0], sizes = [4, 16], strides = [1, 1]} : vector<4x32xf32> to vector<4x16xf32>
    %205 = vector.extract_strided_slice %203 {offsets = [0, 16], sizes = [4, 16], strides = [1, 1]} : vector<4x32xf32> to vector<4x16xf32>
    %206 = arith.addf %204, %205 : vector<4x16xf32>
    %207 = vector.broadcast %5 : vector<1x1xf32> to vector<4x16xf32>
    %208 = arith.addf %206, %207 : vector<4x16xf32>
    %209 = tpu.concatenate %208, %208 in 1 : vector<4x16xf32>, vector<4x16xf32> -> vector<4x32xf32>
    %c0_119 = arith.constant 0 : index
    %c0_120 = arith.constant 0 : index
    %210 = vector.load %arg6[%c0_119, %c0_120] : memref<4x32xf32, #tpu.memory_space<vmem>>, vector<4x32xf32>
    tpu.vector_store %arg6[%c0_119, %c0_120], %209 {strides = array<i32>} : memref<4x32xf32, #tpu.memory_space<vmem>>, vector<4x32xf32>,
    return
  }
}

</mosaic_0001>

<bundles_post_ra>
// kernel: tpu_custom_call.1
= control target key start
LH: loop header
LB: loop body
LE: loop exit
PB: predicated region body
PF: predicated region fallthrough
CT: control target
= control target key end

     0   :  { %13 = vsyncpa [#allocation5], 0  ;;  %v1306_v2 = vmov 0   ;;  %vm46_vm0 = vcmask 1042432   ;;  %vm54_vm1 = vcmask 1045504   ;;  %vm62_vm2 = vcmask 1040384   ;;  %s1696_s0 = inlined_call_operand.vmem [shape: f32[160,1], index: 0, kind: input, shape index: {}]   ;;  %s1697_s1 = inlined_call_operand.vmem [shape: f32[85,16], index: 1, kind: input, shape index: {}]   ;;  %s1698_s2 = inlined_call_operand.vmem [shape: f32[1,69], index: 2, kind: input, shape index: {}]   ;;  %s1699_s3 = inlined_call_operand.vmem [shape: f32[4,2], index: 3, kind: input, shape index: {}]   ;;  %s1700_s4 = inlined_call_operand.vmem [shape: f32[16,4], index: 4, kind: input, shape index: {}]   ;;  %s1701_s5 = inlined_call_operand.vmem [shape: f32[4,256], index: 5, kind: input, shape index: {}]   ;;  %s1702_s6 = inlined_call_operand.hbm [shape: f32[4,32], index: 6, kind: output, shape index: {0}]   ;;  %s1703_s7 = inlined_call_operand.hbm [shape: f32[4,6], index: 7, kind: output, shape index: {1}]  }
   0x1   :  { %v1129_v0 = vld [vmem:[%s1696_s0 + $0x1] ss:$3 sm:$0xff]  ;;  %v29_v1 = vld [vmem:[%s1696_s0] ss:$3 sm:$0xff]  ;;  %1248 = vset.pattern.permute.xlu1 %v1306_v2  ;;  %1247 = vset.pattern.permute.xlu0 %v1306_v2  ;;  %v1123_v7 = vld [vmem:[%s1696_s0 + $0x28] ss:$3 sm:$0xff] }
   0x2   :  { %v1130_v3 = vld [vmem:[%s1696_s0 + $0x19] ss:$3 sm:$0x7]  ;;  %v1131_v4 = vld [vmem:[%s1696_s0 + $0x29] ss:$3 sm:$0xff]  ;;  %149 = vperm.xlu1 %1248, %v1129_v0   ;;  %72 = vperm.xlu0 %1247, %v29_v1   ;;  %v47_v8 = vrot.slane %v1123_v7, 5 }
   0x3   :  { %v126_v5 = vrot.slane %v1131_v4, 5  ;;  %v1122_v6 = vld [vmem:[%s1696_s0 + $0x18] ss:$3 sm:$0x7]  ;;  %v1133_v10 = vld [vmem:[%s1696_s0 + $0x51] ss:$3 sm:$0xff] }
   0x4   :  { %v1132_v9 = vld [vmem:[%s1696_s0 + $0x41] ss:$3 sm:$0x7]  ;;  %v133_v13 = vrot.slane %v1133_v10, 2  ;;  %v67_v15 = vsel %vm46_vm0, %v1122_v6, %v47_v8  ;;  %v1125_v16 = vld [vmem:[%s1696_s0 + $0x50] ss:$3 sm:$0xff] }
   0x5   :  { %v144_v11 = vsel %vm46_vm0, %v1130_v3, %v126_v5  ;;  %v127_v12 = vrot.slane %v1132_v9, 5  ;;  %v1124_v14 = vld [vmem:[%s1696_s0 + $0x40] ss:$3 sm:$0x7]  ;;  %v55_v19 = vrot.slane %v1125_v16, 2 }
   0x6   :  { %v48_v17 = vrot.slane %v1124_v14, 5  ;;  %154 = vperm.xlu1 %1248, %v144_v11   ;;  %77 = vperm.xlu0 %1247, %v67_v15   ;;  %v1139_v20 = vld [vmem:[%s1696_s0 + $0x2a] ss:$3 sm:$0xff]  ;;  %v1138_v23 = vld [vmem:[%s1696_s0 + $0x1a] ss:$3 sm:$0x7] }
   0x7   :  { %v128_v18 = vsel %vm46_vm0, %v126_v5, %v127_v12  ;;  %v209_v24 = vrot.slane %v1139_v20, 5  ;;  %v1134_v26 = vld [vmem:[%s1696_s0 + $0x69] ss:$3 sm:$0x7]  ;;  %v1137_v30 = vld [vmem:[%s1696_s0 + $0x2] ss:$3 sm:$0xff] }
   0x8   :  { %v145_v21 = vsel %vm54_vm1, %v128_v18, %v133_v13  ;;  %v49_v22 = vsel %vm46_vm0, %v47_v8, %v48_v17  ;;  %v1126_v27 = vld [vmem:[%s1696_s0 + $0x68] ss:$3 sm:$0x7]  ;;  %v134_v31 = vrot.slane %v1134_v26, 2  ;;  %v1141_v33 = vld [vmem:[%s1696_s0 + $0x52] ss:$3 sm:$0xff] }
   0x9   :  { %v68_v25 = vsel %vm54_vm1, %v49_v22, %v55_v19  ;;  %v1140_v28 = vld [vmem:[%s1696_s0 + $0x42] ss:$3 sm:$0x7]  ;;  %v227_v29 = vsel %vm46_vm0, %v1138_v23, %v209_v24  ;;  %v56_v32 = vrot.slane %v1126_v27, 2  ;;  %v216_v37 = vrot.slane %v1141_v33, 2 }
   0xa   :  { %159 = vperm.xlu1 %1248, %v145_v21   ;;  %82 = vperm.xlu0 %1247, %v68_v25   ;;  %v210_v34 = vrot.slane %v1140_v28, 5  ;;  %v135_v35 = vsel %vm54_vm1, %v133_v13, %v134_v31  ;;  %v1127_v39 = vld [vmem:[%s1696_s0 + $0x78] ss:$3 sm:$0xff]  ;;  %v1147_v40 = vld [vmem:[%s1696_s0 + $0x2b] ss:$3 sm:$0xff] }
   0xb   :  { %v57_v36 = vsel %vm54_vm1, %v55_v19, %v56_v32  ;;  %v1145_v41 = vld [vmem:[%s1696_s0 + $0x3] ss:$3 sm:$0xff]  ;;  %v63_v43 = vrot.slane %v1127_v39, 7  ;;  %v1146_v44 = vld [vmem:[%s1696_s0 + $0x1b] ss:$3 sm:$0x7] }
   0xc   :  { %v211_v38 = vsel %vm46_vm0, %v209_v24, %v210_v34  ;;  %v292_v45 = vrot.slane %v1147_v40, 5  ;;  %v1142_v46 = vld [vmem:[%s1696_s0 + $0x6a] ss:$3 sm:$0x7]  ;;  %v1135_v47 = vld [vmem:[%s1696_s0 + $0x79] ss:$3 sm:$0xff] }
   0xd   :  { %v228_v42 = vsel %vm54_vm1, %v211_v38, %v216_v37  ;;  %v1148_v48 = vld [vmem:[%s1696_s0 + $0x43] ss:$3 sm:$0x7]  ;;  %v69_v49 = vsel %vm62_vm2, %v56_v32, %v63_v43  ;;  %v217_v51 = vrot.slane %v1142_v46, 2  ;;  %v140_v52 = vrot.slane %v1135_v47, 7 }
   0xe   :  { %237 = vperm.xlu1 %1248, %v227_v29   ;;  %232 = vperm.xlu0 %1247, %v1137_v30   ;;  %v310_v50 = vsel %vm46_vm0, %v1146_v44, %v292_v45  ;;  %v1149_v53 = vld [vmem:[%s1696_s0 + $0x53] ss:$3 sm:$0xff]  ;;  %v293_v54 = vrot.slane %v1148_v48, 5 }
  0x12   :  { %163 = vperm.xlu1 %1248, %v135_v35   ;;  %86 = vperm.xlu0 %1247, %v57_v36  }
  0x16   :  { %315 = vperm.xlu1 %1248, %v1145_v41   ;;  %242 = vperm.xlu0 %1247, %v228_v42  }
  0x17   :  { %14 = vsyncpa [#allocation7], 0  ;;  %v218_v55 = vsel %vm54_vm1, %v216_v37, %v217_v51  ;;  %v146_v56 = vsel %vm62_vm2, %v134_v31, %v140_v52  ;;  %v299_v57 = vrot.slane %v1149_v53, 2  ;;  %v294_v58 = vsel %vm46_vm0, %v292_v45, %v293_v54  ;;  %v1128_v59 = vld [vmem:[%s1696_s0 + $0x90] ss:$3 sm:$0x7] }
  0x18   :  { %v1155_v60 = vld [vmem:[%s1696_s0 + $0x2c] ss:$3 sm:$0xff]  ;;  %v1153_v61 = vld [vmem:[%s1696_s0 + $0x4] ss:$3 sm:$0xff]  ;;  %v64_v63 = vrot.slane %v1128_v59, 7  ;;  %vm440_vm3 = vcmask 130048  }
  0x19   :  { %v311_v62 = vsel %vm54_vm1, %v294_v58, %v299_v57  ;;  %v1154_v0 = vld [vmem:[%s1696_s0 + $0x1c] ss:$3 sm:$0x7]  ;;  %v375_v1 = vrot.slane %v1155_v60, 5  ;;  %v1143_v2 = vld [vmem:[%s1696_s0 + $0x7a] ss:$3 sm:$0xff] }
  0x1a   :  { %91 = vperm.xlu1 %1248, %v69_v49   ;;  %320 = vperm.xlu0 %1247, %v310_v50   ;;  %v1136_v3 = vld [vmem:[%s1696_s0 + $0x91] ss:$3 sm:$0x7]  ;;  %v1156_v4 = vld [vmem:[%s1696_s0 + $0x44] ss:$3 sm:$0x7]  ;;  %v65_v5 = vsel %vm62_vm2, %v63_v43, %v64_v63 }
  0x1b   :  { %v393_v6 = vsel %vm46_vm0, %v1154_v0, %v375_v1  ;;  %v223_v7 = vrot.slane %v1143_v2, 7  ;;  %v141_v8 = vrot.slane %v1136_v3, 7  ;;  %v1157_v9 = vld [vmem:[%s1696_s0 + $0x54] ss:$3 sm:$0xff]  ;;  %v376_v10 = vrot.slane %v1156_v4, 5  ;;  %s1309_s15 = smov 32  }
  0x1c   :  { %v1150_v11 = vld [vmem:[%s1696_s0 + $0x6b] ss:$3 sm:$0x7]  ;;  %v382_v14 = vrot.slane %v1157_v9, 2  ;;  %v1151_v17 = vld [vmem:[%s1696_s0 + $0x7b] ss:$3 sm:$0xff] }
  0x1d   :  { %v229_v12 = vsel %vm62_vm2, %v217_v51, %v223_v7  ;;  %v142_v13 = vsel %vm62_vm2, %v140_v52, %v141_v8  ;;  %v300_v15 = vrot.slane %v1150_v11, 2  ;;  %v377_v16 = vsel %vm46_vm0, %v375_v1, %v376_v10  ;;  %v1144_v18 = vld [vmem:[%s1696_s0 + $0x92] ss:$3 sm:$0x7]  ;;  %v1159_v29 = vld [vmem:[%s1696_s0 + $0x7c] ss:$3 sm:$0xff] }
  0x1e   :  { %246 = vperm.xlu1 %1248, %v218_v55   ;;  %168 = vperm.xlu0 %1247, %v146_v56   ;;  %v394_v19 = vsel %vm54_vm1, %v377_v16, %v382_v14  ;;  %v306_v21 = vrot.slane %v1151_v17, 7  ;;  %v224_v22 = vrot.slane %v1144_v18, 7  ;;  %v1152_v23 = vld [vmem:[%s1696_s0 + $0x93] ss:$3 sm:$0x7]  ;;  %v389_v33 = vrot.slane %v1159_v29, 7 }
  0x1f   :  { %v301_v20 = vsel %vm54_vm1, %v299_v57, %v300_v15  ;;  %v1158_v24 = vld [vmem:[%s1696_s0 + $0x6c] ss:$3 sm:$0x7]  ;;  %v307_v27 = vrot.slane %v1152_v23, 7  ;;  %v1515_v37 = vld [vmem:[%s1698_s2] ss:$0 sm:$0xff]  ;;  %v98_v51 = vlaneseq }
  0x20   :  { %v312_v25 = vsel %vm62_vm2, %v300_v15, %v306_v21  ;;  %v225_v26 = vsel %vm62_vm2, %v223_v7, %v224_v22  ;;  %v383_v28 = vrot.slane %v1158_v24, 2  ;;  %v1160_v30 = vld [vmem:[%s1696_s0 + $0x94] ss:$3 sm:$0x7]  ;;  %s1307_s0 = smov 112   ;;  %v1308_v42 = vmov 0.0  }
  0x21   :  { %v308_v31 = vsel %vm62_vm2, %v306_v21, %v307_v27  ;;  %v390_v34 = vrot.slane %v1160_v30, 7  ;;  %534 = vst.msk [vmem:[#allocation3 + $0x10] sm:$0xff] %vm440_vm3, %v1308_v42  ;;  %532 = vst.msk [vmem:[#allocation3] sm:$0xff] %vm440_vm3, %v1308_v42  ;;  %v99_v54 = vshrl.u32 %v98_v51, 7  ;;  %vm450_vm4 = vcmask 125952   ;;  %s1310_s16 = smov 16  }
  0x22   :  { %398 = vperm.xlu1 %1248, %v1153_v61   ;;  %325 = vperm.xlu0 %1247, %v311_v62   ;;  %v384_v32 = vsel %vm54_vm1, %v382_v14, %v383_v28  ;;  %v395_v36 = vsel %vm62_vm2, %v383_v28, %v389_v33  ;;  %536 = vst.msk [vmem:[#allocation3 + $0x20] sm:$0xff] %vm440_vm3, %v1308_v42  ;;  %538 = vst.msk [vmem:[#allocation3 + $0x30] sm:$0xff] %vm440_vm3, %v1308_v42  ;;  %v28_v62 = vld [vmem:[%s1697_s1] sm:$0x1f]  ;;  %vm544_vm5 = vcmask 126976   ;;  %s1311_s17 = smov 48  }
  0x23   :  { %v391_v35 = vsel %vm62_vm2, %v389_v33, %v390_v34  ;;  %v1527_v57 = vsub.s32 1, %v99_v54  ;;  %v1529_v58 = vsub.s32 0, %v99_v54  ;;  %v260_v59 = vsub.s32 2, %v99_v54  ;;  %s1313_s30 = smov 64   ;;  %s1317_s22 = smov 126  }
  0x24   :  { %v343_v2 = vsub.s32 3, %v99_v54  ;;  %v426_v7 = vsub.s32 4, %v99_v54  ;;  %vm1314_vm6 = vmmov 0   ;;  %vm590_vm7 = vcmask 261120  }
  0x25   :  { %v178_v63 = vrot.slane %v28_v62, %v1527_v57  ;;  %v101_v0 = vrot.slane %v28_v62, %v1529_v58  ;;  %v261_v1 = vrot.slane %v28_v62, %v260_v59  ;;  %1203 = vmatprep.mubr.msk.f32.mxu0 %vm1314_vm6, %v1308_v42  ;;  %1210 = vmatprep.mubr.msk.f32.mxu1 %vm1314_vm6, %v1308_v42  ;;  %vm592_vm8 = vcmask 392192  }
  0x26   :  { %95 = vperm.xlu1 %1248, %v65_v5   ;;  %403 = vperm.xlu0 %1247, %v393_v6   ;;  %v344_v9 = vrot.slane %v28_v62, %v343_v2  ;;  %v427_v18 = vrot.slane %v28_v62, %v426_v7  ;;  %vm594_vm9 = vcmask 523264   ;;  %vm695_vm10 = vcmask 1041408  }
  0x27   :  { %vm697_vm11 = vcmask 1043456   ;;  %vm710_vm12 = vcmask 654336   ;;  %vm815_vm13 = vcmask 123904   ;;  %vm971_vm14 = vcmask 15360  }
  0x28   :  { %vm951_vm15 = vcmask 31744  }
  0x2a   :  { %251 = vperm.xlu1 %1248, %v229_v12   ;;  %172 = vperm.xlu0 %1247, %v142_v13  }
  0x2e   :  { %408 = vperm.xlu1 %1248, %v394_v19   ;;  %329 = vperm.xlu0 %1247, %v301_v20  }
  0x32   :  { %334 = vperm.xlu1 %1248, %v312_v25   ;;  %255 = vperm.xlu0 %1247, %v225_v26  }
  0x36   :  { %338 = vperm.xlu1 %1248, %v308_v31   ;;  %412 = vperm.xlu0 %1247, %v384_v32  }
  0x3a   :  { %421 = vperm.xlu1 %1248, %v391_v35   ;;  %417 = vperm.xlu0 %1247, %v395_v36  }
  0x3e   :  { %511 = vrot.lane.b32.xlu0 %v1515_v37, %s1307_s0 }
  0x81   :  { %v150_v38 = vpop.permute.xlu1 %149  ;;  %v73_v39 = vpop.permute.xlu0 %72 }
  0x82   :  { %v179_v12 = vmul.f32 %v178_v63, %v150_v38  ;;  %v102_v13 = vmul.f32 %v101_v0, %v73_v39 }
  0x84   :  { %v185_v27 = vadd.f32 %v179_v12, %v102_v13 }
  0x85   :  { %v155_v40 = vpop.permute.xlu1 %154  ;;  %v78_v41 = vpop.permute.xlu0 %77 }
  0x86   :  { %v180_v5 = vmul.f32 %v178_v63, %v155_v40  ;;  %v103_v6 = vmul.f32 %v101_v0, %v78_v41 }
  0x88   :  { %v186_v16 = vadd.f32 %v180_v5, %v103_v6 }
  0x89   :  { %v160_v43 = vpop.permute.xlu1 %159  ;;  %v83_v44 = vpop.permute.xlu0 %82 }
  0x8a   :  { %v181_v14 = vmul.f32 %v178_v63, %v160_v43  ;;  %v104_v15 = vmul.f32 %v101_v0, %v83_v44 }
  0x8c   :  { %v187_v28 = vadd.f32 %v181_v14, %v104_v15 }
  0x8d   :  { %v238_v45 = vpop.permute.xlu1 %237  ;;  %v233_v46 = vpop.permute.xlu0 %232 }
  0x8e   :  { %v263_v8 = vmul.f32 %v261_v1, %v238_v45  ;;  %v262_v19 = vmul.f32 %v261_v1, %v233_v46 }
  0x90   :  { %v269_v21 = vadd.f32 %v263_v8, %v186_v16  ;;  %v268_v33 = vadd.f32 %v262_v19, %v185_v27 }
  0x91   :  { %v164_v47 = vpop.permute.xlu1 %163  ;;  %v87_v48 = vpop.permute.xlu0 %86 }
  0x92   :  { %v182_v22 = vmul.f32 %v178_v63, %v164_v47  ;;  %v105_v23 = vmul.f32 %v101_v0, %v87_v48 }
  0x94   :  { %v188_v38 = vadd.f32 %v182_v22, %v105_v23 }
  0x95   :  { %v316_v49 = vpop.permute.xlu1 %315  ;;  %v243_v50 = vpop.permute.xlu0 %242 }
  0x96   :  { %v264_v20 = vmul.f32 %v261_v1, %v243_v50  ;;  %v345_v29 = vmul.f32 %v344_v9, %v316_v49 }
  0x98   :  { %v270_v34 = vadd.f32 %v264_v20, %v187_v28  ;;  %v351_v44 = vadd.f32 %v345_v29, %v268_v33 }
  0x99   :  { %v92_v52 = vpop.permute.xlu1 %91  ;;  %v321_v53 = vpop.permute.xlu0 %320 }
  0x9a   :  { %v346_v17 = vmul.f32 %v344_v9, %v321_v53  ;;  %v106_v48 = vmul.f32 %v101_v0, %v92_v52 }
  0x9c   :  { %v352_v31 = vadd.f32 %v346_v17, %v269_v21 }
  0x9d   :  { %v247_v55 = vpop.permute.xlu1 %246  ;;  %v169_v56 = vpop.permute.xlu0 %168 }
  0x9e   :  { %v265_v32 = vmul.f32 %v261_v1, %v247_v55  ;;  %v183_v39 = vmul.f32 %v178_v63, %v169_v56 }
  0xa0   :  { %v271_v50 = vadd.f32 %v265_v32, %v188_v38  ;;  %v189_v59 = vadd.f32 %v183_v39, %v106_v48 }
  0xa1   :  { %v399_v60 = vpop.permute.xlu1 %398  ;;  %v326_v61 = vpop.permute.xlu0 %325 }
  0xa2   :  { %v347_v30 = vmul.f32 %v344_v9, %v326_v61  ;;  %v428_v35 = vmul.f32 %v427_v18, %v399_v60 }
  0xa4   :  { %v353_v45 = vadd.f32 %v347_v30, %v270_v34  ;;  %v434_v49 = vadd.f32 %v428_v35, %v351_v44 }
  0xa5   :  { %v96_v3 = vpop.permute.xlu1 %95  ;;  %v404_v4 = vpop.permute.xlu0 %403 }
  0xa6   :  { %v429_v24 = vmul.f32 %v427_v18, %v404_v4  ;;  %v107_v53 = vmul.f32 %v101_v0, %v96_v3 }
  0xa8   :  { %v435_v40 = vadd.f32 %v429_v24, %v352_v31 }
  0xa9   :  { %v252_v10 = vpop.permute.xlu1 %251  ;;  %v173_v11 = vpop.permute.xlu0 %172 }
  0xaa   :  { %v184_v46 = vmul.f32 %v178_v63, %v173_v11  ;;  %v266_v51 = vmul.f32 %v261_v1, %v252_v10  ;;  %v442_v60 = vsel %vm440_vm3, %v435_v40, 0.0  ;;  %v441_v63 = vsel %vm440_vm3, %v434_v49, 0.0 }
  0xab   :  { %v443_v0 = vadd.f32 %v442_v60, %v441_v63 }
  0xac   :  { %v190_v2 = vadd.f32 %v184_v46, %v107_v53  ;;  %v272_v7 = vadd.f32 %v266_v51, %v189_v59 }
  0xad   :  { %v409_v25 = vpop.permute.xlu1 %408  ;;  %v330_v26 = vpop.permute.xlu0 %329 }
  0xae   :  { %v430_v36 = vmul.f32 %v427_v18, %v409_v25  ;;  %v348_v47 = vmul.f32 %v344_v9, %v330_v26 }
  0xb0   :  { %v436_v54 = vadd.f32 %v430_v36, %v353_v45  ;;  %v354_v4 = vadd.f32 %v348_v47, %v271_v50 }
  0xb1   :  { %v335_v41 = vpop.permute.xlu1 %334  ;;  %v256_v43 = vpop.permute.xlu0 %255 }
  0xb2   :  { %v267_v55 = vmul.f32 %v261_v1, %v256_v43  ;;  %v349_v61 = vmul.f32 %v344_v9, %v335_v41  ;;  %v444_v52 = vsel %vm440_vm3, %v436_v54, 0.0 }
  0xb3   :  { %v445_v16 = vadd.f32 %v444_v52, %v443_v0 }
  0xb4   :  { %v273_v8 = vadd.f32 %v267_v55, %v190_v2  ;;  %v355_v3 = vadd.f32 %v349_v61, %v272_v7 }
  0xb5   :  { %v339_v62 = vpop.permute.xlu1 %338  ;;  %v413_v56 = vpop.permute.xlu0 %412 }
  0xb6   :  { %v350_v5 = vmul.f32 %v344_v9, %v339_v62  ;;  %v431_v6 = vmul.f32 %v427_v18, %v413_v56 }
  0xb8   :  { %v437_v10 = vadd.f32 %v431_v6, %v354_v4  ;;  %v356_v12 = vadd.f32 %v350_v5, %v273_v8 }
  0xb9   :  { %v422_v1 = vpop.permute.xlu1 %421  ;;  %v418_v11 = vpop.permute.xlu0 %417 }
  0xba   :  { %v446_v13 = vsel %vm440_vm3, %v437_v10, 0.0  ;;  %v433_v14 = vmul.f32 %v427_v18, %v422_v1  ;;  %v432_v15 = vmul.f32 %v427_v18, %v418_v11 }
  0xbb   :  { %v447_v19 = vadd.f32 %v446_v13, %v445_v16 }
  0xbc   :  { %v439_v17 = vadd.f32 %v433_v14, %v356_v12  ;;  %v438_v9 = vadd.f32 %v432_v15, %v355_v3 }
  0xbd   :  { %v512_v3 = vpop.permute.xlu0 %511 }
  0xbe   :  { %v448_v20 = vsel %vm440_vm3, %v438_v9, 0.0  ;;  %v451_v22 = vsel %vm450_vm4, %v439_v17, 0.0 }
  0xbf   :  { %v449_v21 = vadd.f32 %v448_v20, %v447_v19 }
  0xc1   :  { %v452_v23 = vadd.f32 %v451_v22, %v449_v21 }
  0xc3   :  { %v453_v24 = vrot.slane %v452_v23, 4 }
  0xc5   :  { %v454_v25 = vadd.f32 %v453_v24, %v452_v23 }
  0xc7   :  { %v455_v26 = vrot.slane %v454_v25, 2 }
  0xc9   :  { %v456_v27 = vadd.f32 %v455_v26, %v454_v25 }
  0xcb   :  { %v457_v28 = vrot.slane %v456_v27, 1 }
  0xcd   :  { %v458_v29 = vadd.f32 %v457_v28, %v456_v27 }
  0xcf   :  { %v460_v30 = vmul.f32 0.022727273, %v458_v29 }
  0xd1   :  { %v461_v31 = vsub.f32 %v434_v49, %v460_v30  ;;  %v462_v18 = vsub.f32 %v435_v40, %v460_v30  ;;  %v463_v32 = vsub.f32 %v436_v54, %v460_v30  ;;  %v464_v33 = vsub.f32 %v437_v10, %v460_v30 }
  0xd2   :  { %v465_v34 = vsub.f32 %v438_v9, %v460_v30  ;;  %v466_v39 = vsub.f32 %v439_v17, %v460_v30 }
  0xd3   :  { %v467_v35 = vmul.f32 %v461_v31, %v461_v31  ;;  %v468_v36 = vmul.f32 %v462_v18, %v462_v18  ;;  %v469_v38 = vmul.f32 %v463_v32, %v463_v32  ;;  %v470_v41 = vmul.f32 %v464_v33, %v464_v33 }
  0xd4   :  { %v471_v46 = vmul.f32 %v465_v34, %v465_v34  ;;  %v472_v50 = vmul.f32 %v466_v39, %v466_v39 }
  0xd5   :  { %v473_v43 = vsel %vm440_vm3, %v467_v35, 0.0  ;;  %v474_v44 = vsel %vm440_vm3, %v468_v36, 0.0  ;;  %v476_v47 = vsel %vm440_vm3, %v469_v38, 0.0  ;;  %v478_v40 = vsel %vm440_vm3, %v470_v41, 0.0 }
  0xd6   :  { %v475_v45 = vadd.f32 %v474_v44, %v473_v43  ;;  %v480_v49 = vsel %vm440_vm3, %v471_v46, 0.0  ;;  %v482_v54 = vsel %vm450_vm4, %v472_v50, 0.0  ;;  %v701_v50 = vld [vmem:[%s1697_s1 + $0xd] sm:$0xff] }
  0xd8   :  { %v477_v48 = vadd.f32 %v476_v47, %v475_v45 }
  0xda   :  { %v479_v51 = vadd.f32 %v478_v40, %v477_v48  ;;  %v700_v48 = vld [vmem:[%s1697_s1 + $0x5] sm:$0xff]  ;;  %v1312_v40 = vmov 0.0|0.0  }
  0xdb   :  { %1213 = vmatprep.subr.bf16.mxu0 %v1312_v40  ;;  %1228 = vmatprep.subr.bf16.mxu1 %v1312_v40 }
  0xdc   :  { %v481_v53 = vadd.f32 %v480_v49, %v479_v51  ;;  %v1214_v51 = vpack.c.bf16 %v701_v50, %v700_v48  ;;  %v702_v49 = vld [vmem:[%s1697_s1 + $0x15] sm:$0xff] }
  0xde   :  { %v483_v55 = vadd.f32 %v482_v54, %v481_v53  ;;  %v703_v53 = vld [vmem:[%s1697_s1 + $0x1d] sm:$0xff]  ;;  %1215 = vmatpush3.bf16.msra.mxu0 %v1214_v51 }
  0xdf   :  { %1216 = vmatprep.subr.bf16.mxu0 %v1312_v40 }
  0xe0   :  { %v484_v59 = vrot.slane %v483_v55, 4 }
  0xe2   :  { %v485_v60 = vadd.f32 %v484_v59, %v483_v55  ;;  %v1217_v59 = vpack.c.bf16 %v703_v53, %v702_v49 }
  0xe4   :  { %v486_v61 = vrot.slane %v485_v60, 2  ;;  %1218 = vmatpush3.bf16.msra.mxu0 %v1217_v59  ;;  %v859_v59 = vld [vmem:[%s1700_s4] sm:$0xff] }
  0xe5   :  { %1219 = vmatprep.subr.bf16.mxu0 %v1312_v40 }
  0xe6   :  { %v487_v62 = vadd.f32 %v486_v61, %v485_v60  ;;  %v704_v60 = vld [vmem:[%s1697_s1 + $0x25] sm:$0xff]  ;;  %v705_v61 = vld [vmem:[%s1697_s1 + $0x2d] sm:$0xff] }
  0xe8   :  { %v488_v56 = vrot.slane %v487_v62, 1 }
  0xea   :  { %v489_v2 = vadd.f32 %v488_v56, %v487_v62 }
  0xec   :  { %v490_v4 = vmul.f32 0.022727273, %v489_v2  ;;  %v1220_v2 = vpack.c.bf16 %v705_v61, %v704_v60  ;;  %v860_v60 = vld [vmem:[%s1700_s4 + $0x8] sm:$0xff] }
  0xed   :  { %v1229_v61 = vpack.c.bf16 %v860_v60, %v859_v59 }
  0xee   :  { %v491_v5 = vadd.f32 1e-05, %v490_v4  ;;  %v706_v4 = vld [vmem:[%s1697_s1 + $0x35] sm:$0xff]  ;;  %1221 = vmatpush3.bf16.msra.mxu0 %v1220_v2 }
  0xef   :  { %1222 = vmatprep.subr.bf16.mxu0 %v1312_v40  ;;  %1230 = vmatpush3.bf16.msra.mxu1 %v1229_v61 }
  0xf0   :  { %1252 = vrsqrt.f32 %v491_v5  ;;  %v707_v5 = vld [vmem:[%s1697_s1 + $0x3d] sm:$0xff] }
  0xfa   :  { %v1253_v6 = vpop.eup %1252 }
  0xfb   :  { %v497_v7 = vmul.f32 %v1253_v6, %v465_v34  ;;  %v493_v63 = vmul.f32 %v1253_v6, %v461_v31  ;;  %v494_v52 = vmul.f32 %v1253_v6, %v462_v18  ;;  %v495_v8 = vmul.f32 %v1253_v6, %v463_v32 }
  0xfc   :  { %v496_v10 = vmul.f32 %v1253_v6, %v464_v33  ;;  %v498_v0 = vmul.f32 %v1253_v6, %v466_v39 }
  0xfd   :  { %v509_v1 = vmul.f32 %v1515_v37, %v497_v7  ;;  %v505_v11 = vmul.f32 %v1515_v37, %v493_v63  ;;  %v506_v12 = vmul.f32 %v1515_v37, %v494_v52  ;;  %v507_v13 = vmul.f32 %v1515_v37, %v495_v8  ;;  %v708_v52 = vld [vmem:[%s1697_s1 + $0x45] sm:$0xff]  ;;  %v709_v8 = vld [vmem:[%s1697_s1 + $0x4d] sm:$0xff]  ;;  %s1316_s1 = smov 80  }
  0xfe   :  { %v508_v14 = vmul.f32 %v1515_v37, %v496_v10  ;;  %v510_v15 = vmul.f32 %v1515_v37, %v498_v0  ;;  %v1223_v63 = vpack.c.bf16 %v707_v5, %v706_v4 }
  0xff   :  { %v514_v16 = vadd.f32 %v512_v3, %v505_v11  ;;  %v515_v17 = vadd.f32 %v512_v3, %v506_v12  ;;  %v516_v9 = vadd.f32 %v512_v3, %v507_v13  ;;  %v518_v19 = vadd.f32 %v512_v3, %v509_v1 }
 0x100   :  { %v517_v20 = vadd.f32 %v512_v3, %v508_v14  ;;  %v519_v21 = vadd.f32 %v512_v3, %v510_v15  ;;  %1224 = vmatpush3.bf16.msra.mxu0 %v1223_v63  ;;  %v1226_v3 = vpack.c.bf16 %v709_v8, %v708_v52 }
 0x101   :  { %v520_v22 = vmax.f32 %v514_v16, 0.0  ;;  %v521_v23 = vmax.f32 %v515_v17, 0.0  ;;  %v522_v24 = vmax.f32 %v516_v9, 0.0  ;;  %v524_v25 = vmax.f32 %v518_v19, 0.0  ;;  %1225 = vmatprep.subr.bf16.mxu0 %v1312_v40 }
 0x102   :  { %v523_v26 = vmax.f32 %v517_v20, 0.0  ;;  %v525_v27 = vmax.f32 %v519_v21, 0.0 }
 0x103   :  { %526 = vst.msk [vmem:[#allocation2] sm:$0xff] %vm440_vm3, %v520_v22  ;;  %527 = vst.msk [vmem:[#allocation2 + $0x8] sm:$0xff] %vm440_vm3, %v521_v23 }
 0x104   :  { %528 = vst.msk [vmem:[#allocation2 + $0x10] sm:$0xff] %vm440_vm3, %v522_v24  ;;  %530 = vst.msk [vmem:[#allocation2 + $0x20] sm:$0xff] %vm440_vm3, %v524_v25  ;;  %1227 = vmatpush3.bf16.msra.mxu0 %v1226_v3 }
 0x105   :  { %529 = vst.msk [vmem:[#allocation2 + $0x18] sm:$0xff] %vm440_vm3, %v523_v26 }
 0x106   :  { %531 = vst.msk [vmem:[#allocation2 + $0x28] sm:$0xf] %vm450_vm4, %v525_v27 }
 0x10a   :  { %v540_v33 = vld [vmem:[#allocation2] ss:$2 sm:$0x1f]  ;;  %v542_v34 = vld [vmem:[#allocation2 + $0x1] ss:$2 sm:$0x1f] }
 0x10b   :  { %v547_v28 = vld [vmem:[#allocation2 + $0xb] ss:$2 sm:$0x1f]  ;;  %v549_v29 = vld [vmem:[#allocation2 + $0xc] ss:$2 sm:$0x1f]  ;;  %v543_v35 = vmax.f32 %v540_v33, %v542_v34 }
 0x10c   :  { %v550_v30 = vmax.f32 %v547_v28, %v549_v29  ;;  %v553_v31 = vld [vmem:[#allocation2 + $0x16] ss:$2 sm:$0x1f]  ;;  %v555_v18 = vld [vmem:[#allocation2 + $0x17] ss:$2 sm:$0x1f] }
 0x10d   :  { %v556_v32 = vmax.f32 %v553_v31, %v555_v18  ;;  %v559_v36 = vld [vmem:[#allocation2 + $0x21] ss:$2 sm:$0x1f]  ;;  %v561_v38 = vld [vmem:[#allocation2 + $0x22] ss:$2 sm:$0x1f] }
 0x10e   :  { %551 = vst.msk [vmem:[#allocation3 + $0x12] sm:$0x1f] %vm544_vm5, %v550_v30  ;;  %v562_v39 = vmax.f32 %v559_v36, %v561_v38  ;;  %545 = vst.msk [vmem:[#allocation3 + $0x2] sm:$0x1f] %vm544_vm5, %v543_v35 }
 0x10f   :  { %557 = vst.msk [vmem:[#allocation3 + $0x22] sm:$0x1f] %vm544_vm5, %v556_v32 }
 0x110   :  { %563 = vst.msk [vmem:[#allocation3 + $0x32] sm:$0x1f] %vm544_vm5, %v562_v39 }
 0x115   :  { %v601_v41 = vld [vmem:[#allocation3 + $0x12] ss:$3 sm:$0x3]  ;;  %v599_v43 = vld [vmem:[#allocation3 + $0x11] ss:$3 sm:$0x3] }
 0x116   :  { %611 = vrot.lane.b32.xlu0 %v601_v41, %s1309_s15  ;;  %607 = vrot.lane.b32.xlu1 %v599_v43, %s1310_s16  ;;  %v629_v44 = vld [vmem:[#allocation3 + $0x21] ss:$3 sm:$0x3]  ;;  %v603_v46 = vld [vmem:[#allocation3 + $0x13] ss:$3 sm:$0x3] }
 0x117   :  { %v566_v45 = vld [vmem:[#allocation3 + $0x1] ss:$3 sm:$0x3]  ;;  %v631_v47 = vld [vmem:[#allocation3 + $0x22] ss:$3 sm:$0x3] }
 0x118   :  { %v659_v54 = vld [vmem:[#allocation3 + $0x31] ss:$3 sm:$0x3]  ;;  %v568_v55 = vld [vmem:[#allocation3 + $0x2] ss:$3 sm:$0x3] }
 0x119   :  { %v605_v62 = vld [vmem:[#allocation3 + $0x14] ss:$3 sm:$0x3]  ;;  %v633_v56 = vld [vmem:[#allocation3 + $0x23] ss:$3 sm:$0x3] }
 0x11a   :  { %637 = vrot.lane.b32.xlu1 %v629_v44, %s1310_s16  ;;  %574 = vrot.lane.b32.xlu0 %v566_v45, %s1310_s16  ;;  %v661_v6 = vld [vmem:[#allocation3 + $0x32] ss:$3 sm:$0x3]  ;;  %v570_v7 = vld [vmem:[#allocation3 + $0x3] ss:$3 sm:$0x3] }
 0x11b   :  { %v635_v10 = vld [vmem:[#allocation3 + $0x24] ss:$3 sm:$0x3]  ;;  %v663_v0 = vld [vmem:[#allocation3 + $0x33] ss:$3 sm:$0x3] }
 0x11c   :  { %v572_v1 = vld [vmem:[#allocation3 + $0x4] ss:$3 sm:$0x3]  ;;  %v665_v11 = vld [vmem:[#allocation3 + $0x34] ss:$3 sm:$0x3] }
 0x11d   :  { %v597_v22 = vld [vmem:[#allocation3 + $0x10] ss:$3 sm:$0x3]  ;;  %v627_v26 = vld [vmem:[#allocation3 + $0x20] ss:$3 sm:$0x3] }
 0x11e   :  { %615 = vrot.lane.b32.xlu1 %v603_v46, %s1311_s17  ;;  %641 = vrot.lane.b32.xlu0 %v631_v47, %s1309_s15  ;;  %v564_v32 = vld [vmem:[#allocation3] ss:$3 sm:$0x3]  ;;  %v657_v33 = vld [vmem:[#allocation3 + $0x30] ss:$3 sm:$0x3] }
 0x122   :  { %667 = vrot.lane.b32.xlu1 %v659_v54, %s1310_s16  ;;  %578 = vrot.lane.b32.xlu0 %v568_v55, %s1309_s15 }
 0x126   :  { %619 = vrot.lane.b32.xlu1 %v605_v62, %s1313_s30  ;;  %645 = vrot.lane.b32.xlu0 %v633_v56, %s1311_s17 }
 0x12a   :  { %671 = vrot.lane.b32.xlu1 %v661_v6, %s1309_s15  ;;  %582 = vrot.lane.b32.xlu0 %v570_v7, %s1311_s17  ;;  %s1315_s15 = smov 96  }
 0x12e   :  { %649 = vrot.lane.b32.xlu1 %v635_v10, %s1313_s30  ;;  %675 = vrot.lane.b32.xlu0 %v663_v0, %s1311_s17 }
 0x132   :  { %586 = vrot.lane.b32.xlu1 %v572_v1, %s1313_s30  ;;  %679 = vrot.lane.b32.xlu0 %v665_v11, %s1313_s30 }
 0x136   :  { %806 = vrot.lane.b32.xlu1 %v1515_v37, %s1315_s15  ;;  %810 = vrot.lane.b32.xlu0 %v1515_v37, %s1316_s1 }
 0x13a   :  { %861 = vrot.lane.b32.xlu1 %v1515_v37, %s1313_s30 }
 0x188   :  { %v612_v12 = vpop.permute.xlu0 %611  ;;  %v608_v13 = vpop.permute.xlu1 %607 }
 0x189   :  { %v622_v23 = vsel %vm440_vm3, %v597_v22, %v608_v13 }
 0x18a   :  { %v623_v28 = vsel %vm590_vm7, %v622_v23, %v612_v12 }
 0x18c   :  { %v638_v14 = vpop.permute.xlu1 %637  ;;  %v575_v15 = vpop.permute.xlu0 %574 }
 0x18d   :  { %v652_v27 = vsel %vm440_vm3, %v627_v26, %v638_v14  ;;  %v589_v36 = vsel %vm440_vm3, %v564_v32, %v575_v15 }
 0x190   :  { %v616_v16 = vpop.permute.xlu1 %615  ;;  %v642_v17 = vpop.permute.xlu0 %641 }
 0x191   :  { %v624_v29 = vsel %vm592_vm8, %v623_v28, %v616_v16  ;;  %v653_v30 = vsel %vm590_vm7, %v652_v27, %v642_v17 }
 0x194   :  { %v668_v9 = vpop.permute.xlu1 %667  ;;  %v579_v19 = vpop.permute.xlu0 %578 }
 0x195   :  { %v682_v38 = vsel %vm440_vm3, %v657_v33, %v668_v9  ;;  %v591_v41 = vsel %vm590_vm7, %v589_v36, %v579_v19 }
 0x198   :  { %v620_v20 = vpop.permute.xlu1 %619  ;;  %v646_v21 = vpop.permute.xlu0 %645 }
 0x199   :  { %v625_v34 = vsel %vm594_vm9, %v624_v29, %v620_v20  ;;  %v654_v35 = vsel %vm592_vm8, %v653_v30, %v646_v21 }
 0x19a   :  { %v687_v44 = vrot.slane %v625_v34, 6 }
 0x19c   :  { %v672_v24 = vpop.permute.xlu1 %671  ;;  %v583_v25 = vpop.permute.xlu0 %582 }
 0x19d   :  { %v683_v43 = vsel %vm590_vm7, %v682_v38, %v672_v24  ;;  %v593_v45 = vsel %vm592_vm8, %v591_v41, %v583_v25 }
 0x1a0   :  { %v650_v31 = vpop.permute.xlu1 %649  ;;  %v676_v18 = vpop.permute.xlu0 %675 }
 0x1a1   :  { %v655_v39 = vsel %vm594_vm9, %v654_v35, %v650_v31  ;;  %v684_v46 = vsel %vm592_vm8, %v683_v43, %v676_v18 }
 0x1a2   :  { %v690_v50 = vrot.slane %v655_v39, 4 }
 0x1a4   :  { %v587_v47 = vpop.permute.xlu1 %586  ;;  %v680_v48 = vpop.permute.xlu0 %679 }
 0x1a5   :  { %v595_v40 = vsel %vm594_vm9, %v593_v45, %v587_v47  ;;  %v685_v51 = vsel %vm594_vm9, %v684_v46, %v680_v48 }
 0x1a6   :  { %v696_v49 = vsel %vm695_vm10, %v595_v40, %v687_v44  ;;  %v693_v53 = vrot.slane %v685_v51, 2 }
 0x1a7   :  { %v698_v54 = vsel %vm697_vm11, %v696_v49, %v690_v50 }
 0x1a8   :  { %v699_v55 = vsel %vm54_vm1, %v698_v54, %v693_v53  ;;  %v807_v19 = vpop.permute.xlu1 %806  ;;  %v811_v21 = vpop.permute.xlu0 %810 }
 0x1a9   :  { %1204 = vmatmul.mubr.msk.f32.vlgmr.msra.gmra.mrb[0].mxu0 %vm710_vm12, %v699_v55 }
 0x27c   :  { %v780_v62 = vpop.f32.mrb[0].mxu0 }
 0x27d   :  { %v784_v56 = vsel %vm440_vm3, %v780_v62, 0.0  ;;  %v1205_v2 = vpop.f32.mrb[1].mxu0 }
 0x27e   :  { %v785_v4 = vrot.slane %v784_v56, 4 }
 0x280   :  { %v786_v5 = vadd.f32 %v785_v4, %v784_v56 }
 0x282   :  { %v787_v6 = vrot.slane %v786_v5, 2 }
 0x284   :  { %v788_v7 = vadd.f32 %v787_v6, %v786_v5 }
 0x286   :  { %v789_v63 = vrot.slane %v788_v7, 1 }
 0x288   :  { %v790_v52 = vadd.f32 %v789_v63, %v788_v7  ;;  %v955_v7 = vld [vmem:[%s1701_s5] sm:$0x33] }
 0x289   :  { %v970_v63 = vcombine.high %v955_v7, %v955_v7 }
 0x28a   :  { %v792_v8 = vmul.f32 0.125, %v790_v52  ;;  %v862_v52 = vpop.permute.xlu1 %861 }
 0x28b   :  { %1165 = vmatprep.subr.msk.mxu1 %vm695_vm10, %v970_v63 }
 0x28c   :  { %v793_v10 = vsub.f32 %v780_v62, %v792_v8 }
 0x28e   :  { %v794_v0 = vmul.f32 %v793_v10, %v793_v10 }
 0x290   :  { %v795_v3 = vsel %vm440_vm3, %v794_v0, 0.0 }
 0x291   :  { %v796_v1 = vrot.slane %v795_v3, 4 }
 0x293   :  { %v797_v11 = vadd.f32 %v796_v1, %v795_v3 }
 0x295   :  { %v798_v12 = vrot.slane %v797_v11, 2 }
 0x297   :  { %v799_v13 = vadd.f32 %v798_v12, %v797_v11 }
 0x299   :  { %v800_v14 = vrot.slane %v799_v13, 1 }
 0x29b   :  { %v801_v15 = vadd.f32 %v800_v14, %v799_v13 }
 0x29d   :  { %v802_v16 = vmul.f32 0.125, %v801_v15  ;;  %v1318_v15 = vmov 68  }
 0x29e   :  { %1249 = vset.pattern.permute.xlu1 %v1318_v15  ;;  %1250 = vset.pattern.permute.xlu0 %v1318_v15 }
 0x29f   :  { %v803_v17 = vadd.f32 1e-05, %v802_v16  ;;  %v1164_v16 = vld [vmem:[%s1701_s5 + $0x2] ss:$4 sm:$0x3] }
 0x2a1   :  { %1254 = vrsqrt.f32 %v803_v17  ;;  %v962_v17 = vrot.slane %v1164_v16, %v1529_v58 }
 0x2ab   :  { %v1255_v9 = vpop.eup %1254 }
 0x2ac   :  { %v805_v20 = vmul.f32 %v1255_v9, %v793_v10  ;;  %v1168_v9 = vld [vmem:[%s1701_s5 + $0x3] ss:$4 sm:$0x3]  ;;  %s1320_s5 = smov [#allocation6]  }
 0x2ad   :  { %s1110_s29 = sshll.u32 %s1320_s5, 4  ;;  %s1111_s29 = int_to_ptr.vmem [resolvable:$true] %s1110_s29 }
 0x2ae   :  { %v809_v22 = vmul.f32 %v807_v19, %v805_v20  ;;  %v966_v19 = vrot.slane %v1164_v16, %v1527_v57  ;;  %p1263_p1 = scmp.lt.s32.totalorder %s1111_s29, %s1111_s29 }
 0x2b0   :  { %v813_v23 = vadd.f32 %v811_v21, %v809_v22  ;;  %v1057_v22 = vrot.slane %v1168_v9, %v1529_v58 }
 0x2b2   :  { %v814_v24 = vmax.f32 %v813_v23, 0.0 }
 0x2b4   :  { %v816_v25 = vsel %vm815_vm13, %v814_v24, 0.0  ;;  %v826_v26 = vrot.slane %v814_v24, 2  ;;  %v836_v27 = vrot.slane %v814_v24, 4  ;;  %v846_v28 = vrot.slane %v814_v24, 6 }
 0x2b5   :  { %v817_v29 = vrot.slane %v816_v25, 4 }
 0x2b6   :  { %v828_v30 = vsel %vm815_vm13, %v826_v26, 0.0  ;;  %v838_v31 = vsel %vm815_vm13, %v836_v27, 0.0  ;;  %v848_v18 = vsel %vm815_vm13, %v846_v28, 0.0 }
 0x2b7   :  { %v818_v32 = vadd.f32 %v817_v29, %v816_v25  ;;  %v829_v33 = vrot.slane %v828_v30, 4  ;;  %v839_v34 = vrot.slane %v838_v31, 4  ;;  %v849_v35 = vrot.slane %v848_v18, 4 }
 0x2b8   :  { %v1061_v25 = vrot.slane %v1168_v9, %v1527_v57 }
 0x2b9   :  { %v819_v36 = vrot.slane %v818_v32, 2  ;;  %v830_v38 = vadd.f32 %v829_v33, %v828_v30  ;;  %v840_v39 = vadd.f32 %v839_v34, %v838_v31  ;;  %v850_v41 = vadd.f32 %v849_v35, %v848_v18 }
 0x2bb   :  { %v820_v43 = vadd.f32 %v819_v36, %v818_v32  ;;  %v831_v44 = vrot.slane %v830_v38, 2  ;;  %v841_v45 = vrot.slane %v840_v39, 2  ;;  %v851_v46 = vrot.slane %v850_v41, 2 }
 0x2bd   :  { %v821_v47 = vrot.slane %v820_v43, 1  ;;  %v832_v48 = vadd.f32 %v831_v44, %v830_v38  ;;  %v842_v50 = vadd.f32 %v841_v45, %v840_v39  ;;  %v852_v40 = vadd.f32 %v851_v46, %v850_v41 }
 0x2bf   :  { %v822_v51 = vadd.f32 %v821_v47, %v820_v43  ;;  %v833_v49 = vrot.slane %v832_v48, 1  ;;  %v843_v53 = vrot.slane %v842_v50, 1  ;;  %v853_v54 = vrot.slane %v852_v40, 1 }
 0x2c1   :  { %v834_v55 = vadd.f32 %v833_v49, %v832_v48  ;;  %v844_v59 = vadd.f32 %v843_v53, %v842_v50  ;;  %v854_v60 = vadd.f32 %v853_v54, %v852_v40  ;;  %v824_v61 = vmul.f32 0.5, %v822_v51 }
 0x2c3   :  { %v835_v62 = vmul.f32 0.5, %v834_v55  ;;  %v845_v56 = vmul.f32 0.5, %v844_v59  ;;  %v855_v2 = vmul.f32 0.5, %v854_v60 }
 0x2c5   :  { %v856_v4 = vsel %vm62_vm2, %v824_v61, %v835_v62 }
 0x2c6   :  { %v857_v5 = vsel %vm695_vm10, %v856_v4, %v845_v56 }
 0x2c7   :  { %v858_v6 = vsel %vm46_vm0, %v857_v5, %v855_v2  ;;  %vm953_vm0 = vcmask 44032  }
 0x2c8   :  { %1211 = vmatmul.mubr.msk.f32.vlgmr.msra.gmra.mrb[0].mxu1 %vm440_vm3, %v858_v6 }
 0x2c9   :  { %1042 = vmatprep.mubr.f32.mxu1 %v1308_v42  ;;  %1166 = vmatpush1.msk.msra.mxu1 %vm695_vm10, %v955_v7  ;;  %v937_v42 = vld [vmem:[%s1699_s3] sm:$0xf]  ;;  %s1319_s3 = smov 4  }
 0x39b   :  { %v933_v8 = vpop.f32.mrb[0].mxu1 }
 0x39c   :  { %v934_v10 = vadd.f32 %v933_v8, %v862_v52  ;;  %v1212_v0 = vpop.f32.mrb[1].mxu1 }
 0x39e   :  { %v938_v3 = vmul.f32 0.5, %v934_v10 }
 0x3a0   :  { %v939_v1 = vmul.f32 1.442695, %v938_v3 }
 0x3a2   :  { %1256 = vpow2.f32 %v939_v1 }
 0x3ac   :  { %v1257_v11 = vpop.eup %1256 }
 0x3ad   :  { %942 = vrot.lane.b32.xlu0 %v1257_v11, %s1317_s22 }
 0x41f   :  { %v943_v12 = vpop.permute.xlu0 %942 }
 0x420   :  { %v945_v13 = vmul.f32 %v943_v12, %v937_v42 }
 0x422   :  { %v946_v14 = vadd.f32 %v945_v13, %v934_v10 }
 0x424   :  { %1167 = vmatmul.mubr.msk.f32.vlgmr.msra.gmra.mrb[2].mxu1 %vm971_vm14, %v946_v14 }
 0x4f7   :  { %v1044_v20 = vpop.f32.mrb[2].mxu1 }
 0x4f8   :  { %v1045_v21 = vadd.f32 %v1044_v20, %v962_v17  ;;  %v1046_v23 = vpop.f32.mrb[3].mxu1 }
 0x4f9   :  { %v1047_v24 = vadd.f32 %v1046_v23, %v966_v19 }
 0x4fa   :  { %v1049_v26 = vmax.f32 %v1045_v21, 0.0 }
 0x4fb   :  { %v1050_v27 = vmax.f32 %v1047_v24, 0.0 }
 0x4fc   :  { %v1064_v28 = vmul.f32 %v1057_v22, %v1049_v26 }
 0x4fd   :  { %v1065_v29 = vmul.f32 %v1061_v25, %v1050_v27 }
 0x4ff   :  { %v1066_v30 = vadd.f32 %v1065_v29, %v1064_v28 }
 0x501   :  { %1068 = vrot.lane.b32.xlu1 %v1066_v30, %s1313_s30  ;;  %s1258_s30 = scalar_lea.vmem %s1111_s29, 64 }
 0x502   :  { %p1259_p0 = scmp.ne.s32.totalorder %s1111_s29, %s1258_s30  ;;  %p1264_p2 = scmp.lt.s32.totalorder %s1258_s30, %s1258_s30 }
 0x504   :  { %p1265_p3 = por %p1264_p2, %p1263_p1 }
 0x505   :  { %1083 = vperm.xlu1 %1249, %v1515_v37  }
 0x506   :  { %p1266_p4 = pnand %p1265_p3, %p1259_p0 }
 0x509   :  { %948 = vrot.lane.b32.xlu1 %v946_v14, %s1319_s3 }
 0x573   :  { %v1069_v31 = vpop.permute.xlu1 %1068 }
 0x574   :  { %v1071_v18 = vadd.f32 %v1069_v31, %v1066_v30 }
 0x576   :  { %1073 = vrot.lane.b32.xlu0 %v1071_v18, %s1315_s15 }
 0x584   :  { %v1084_v58 = vpop.permute.xlu1 %1083 }
 0x588   :  { %v949_v32 = vpop.permute.xlu1 %948 }
 0x589   :  { %v952_v57 = vsel %vm951_vm15, %v934_v10, %v949_v32 }
 0x58a   :  { %954 = vst.msk [vmem:[#allocation6] sm:$0xf] %vm953_vm0, %v952_v57 }
 0x5e8   :  { %v1074_v33 = vpop.permute.xlu0 %1073 }
 0x5e9   :  { %v1076_v34 = vadd.f32 %v1074_v33, %v1071_v18 }
 0x5eb   :  { %1078 = vrot.lane.b32.xlu0 %v1076_v34, %s1307_s0 }
 0x5ec   :  { %1269 = shalt.err (!%p1266_p4)
}
 0x5ed   :  { %s1270_s10 = scalar_lea.hbm %s1703_s7, 64 }
 0x5ee   :  { %p1271_p5 = scmp.ne.s32.totalorder %s1703_s7, %s1270_s10  ;;  %p1274_p6 = scmp.lt.u32.totalorder %s1270_s10, %s1703_s7 }
 0x5f0   :  { %p1276_p7 = pnand %p1274_p6, %p1271_p5 }
 0x5f2   :  { %1279 = shalt.err (!%p1276_p7)
}
 0x5f3   :  { %1113 = dma.vmem_to_hbm [thread:$0]  %s1111_s29, 64, %s1703_s7, [#allocation7]   ;;  %vm1092_vm1 = vcmask 257024  }
 0x5f4   :  { %s1321_s15 = smov [#allocation4]  }
 0x5f5   :  { %s1100_s1 = sshll.u32 %s1321_s15, 4  ;;  %s1101_s1 = int_to_ptr.vmem [resolvable:$true] %s1100_s1 }
 0x5f6   :  { %s1280_s17 = scalar_lea.vmem %s1101_s1, 64  ;;  %p1285_p9 = scmp.lt.s32.totalorder %s1101_s1, %s1101_s1 }
 0x5f7   :  { %p1281_p8 = scmp.ne.s32.totalorder %s1101_s1, %s1280_s17  ;;  %p1286_p10 = scmp.lt.s32.totalorder %s1280_s17, %s1280_s17 }
 0x5f9   :  { %p1287_p11 = por %p1286_p10, %p1285_p9 }
 0x5fb   :  { %p1288_p12 = pnand %p1287_p11, %p1281_p8 }
 0x65d   :  { %v1079_v37 = vpop.permute.xlu0 %1078 }
 0x65e   :  { %v1081_v35 = vadd.f32 %v1079_v37, %v1076_v34 }
 0x660   :  { %v1086_v36 = vadd.f32 %v1084_v58, %v1081_v35 }
 0x662   :  { %1088 = vrot.lane.b32.xlu0 %v1086_v36, %s1310_s16 }
 0x6d4   :  { %v1089_v38 = vpop.permute.xlu0 %1088 }
 0x6d5   :  { %v1091_v39 = vsel %vm440_vm3, %v1086_v36, %v1089_v38 }
 0x6d6   :  { %1093 = vst.msk [vmem:[#allocation4] sm:$0xf] %vm1092_vm1, %v1091_v39 }
 0x6d7   :  { %1291 = shalt.err (!%p1288_p12)
}
 0x6d8   :  { %s1292_s19 = scalar_lea.hbm %s1702_s6, 64 }
 0x6d9   :  { %p1293_p13 = scmp.ne.s32.totalorder %s1702_s6, %s1292_s19  ;;  %p1296_p0 = scmp.lt.u32.totalorder %s1292_s19, %s1702_s6 }
 0x6db   :  { %p1298_p1 = pnand %p1296_p0, %p1293_p13 }
 0x6dd   :  { %1301 = shalt.err (!%p1298_p1)
}
 0x6de   :  { %1103 = dma.vmem_to_hbm [thread:$0]  %s1101_s1, 64, %s1702_s6, [#allocation5]  }
 0x6df   :  { %1302 = dma.done.wait [#allocation5], 64  }
 0x6e0   :  { %1303 = vsyncadd [#allocation5], 4294967232 }
 0x6e1   :  { %1304 = dma.done.wait [#allocation7], 64  }
 0x6e2   :  { %1305 = vsyncadd [#allocation7], 4294967232 }
 0x6e3   :  { %1120 = vsyncpa [#allocation5], 1 }
 0x6e4   :  { %1121 = vsyncpa [#allocation7], 1 }

</bundles_post_ra>
